<compile_context>
chip_gen: v5e
topology: v5e:2x2
jax: 0.10.0
libtpu: 0.0.40
codegen_flags: <defaults>
</compile_context>

<pallas_src>
import functools

import numpy as np
import jax
import jax.numpy as jnp
from jax import lax
from jax.experimental import pallas as pl
from jax.experimental.pallas import tpu as pltpu

POOL = 8
LEAKY_SLOPE = 0.01   # nn.LeakyReLU default
BN_EPS = 1e-5        # nn.BatchNorm2d default


# ---------------------------------------------------------------------------
# Fused kernel: per-batch conv->leaky->pool->concat, BN finalize at last step
# ---------------------------------------------------------------------------
def _fused_kernel(x_ref, w1, b1, pm1, w2, b2, pm2, w3, b3, pm3,
                  g_ref, be_ref, out_ref, *, ks):
    bidx = pl.program_id(0)
    x = x_ref[0]                       # (C_pad, H*W) -- time on the lane axis
    hw = x.shape[1]
    o_ch = b1.shape[0]                 # num_T

    slab = None                        # (num_T, H * t_cat)
    for w_ref, bias_ref, pm_ref, k in ((w1, b1, pm1, ks[0]),
                                       (w2, b2, pm2, ks[1]),
                                       (w3, b3, pm3, ks[2])):
        # All (tap, out_channel) partial products in ONE lane-dense matmul.
        # Rows of p are ordered (tap dt major, out channel o minor).
        p = jnp.dot(w_ref[...], x, preferred_element_type=jnp.float32)   # (k*O, HW)
        # Valid conv = sum over taps of lane-rotated partials (static unroll, XLU).
        # Bias is folded into the dt == 0 term.  Rotation wrap only touches the
        # t >= t_out tail of each 64-wide h block, which the pooling matrix zeroes.
        acc = bias_ref[...] + p[0:o_ch, :]
        for dt in range(1, k):
            acc = acc + pltpu.roll(p[dt * o_ch:(dt + 1) * o_ch, :],
                                   shift=hw - dt, axis=1)
        acc = jnp.where(acc > 0, acc, LEAKY_SLOPE * acc)                 # LeakyReLU
        # AvgPool(1, 8) + 1/8 scale + placement into the time-concatenated slab,
        # all as one constant matmul.
        pooled = jnp.dot(acc, pm_ref[...], preferred_element_type=jnp.float32)
        slab = pooled if slab is None else slab + pooled
    out_ref[bidx] = slab                                                 # (O, H*t_cat)

    # Finalize: BatchNorm2d (training mode -> batch statistics, biased variance)
    # over the VMEM-resident output once the last batch element is produced.
    @pl.when(bidx == pl.num_programs(0) - 1)
    def _():
        y = out_ref[...]                                    # (B, num_T, H*t_cat)
        n = y.shape[0] * y.shape[2]
        mean = jnp.sum(jnp.sum(y, axis=0), axis=1, keepdims=True) / n    # (O, 1)
        cen = y - mean[None]
        var = jnp.sum(jnp.sum(cen * cen, axis=0), axis=1, keepdims=True) / n
        yn = cen * lax.rsqrt(var + BN_EPS)[None]
        out_ref[...] = yn * g_ref[...][None] + be_ref[...][None]
        # TODO(synk): running_mean / running_var buffer updates (training side
        # effect) are not reproduced; they do not affect the forward output.


# ---------------------------------------------------------------------------
# Wrapper: layout plumbing, constant-matrix construction, pallas_call
# ---------------------------------------------------------------------------
def temporal_inception_block(x_nchw, params):
    B, C, H, W = x_nchw.shape
    HW = H * W
    C_pad = ((C + 7) // 8) * 8

    # Layout plumbing (wrapper-side, pure XLA): flatten (H, W) onto the lane axis
    # and zero-pad the tiny channel contraction to a sublane multiple.
    x3 = x_nchw.reshape(B, C, HW)
    if C_pad != C:
        x3 = jnp.pad(x3, ((0, 0), (0, C_pad - C), (0, 0)))

    walls, biases, ks, tps = [], [], [], []
    for name in ("conv1", "conv2", "conv3"):
        w = params[name + "_w"]                    # (O, C, 1, k)  PyTorch OIHW
        bvec = params[name + "_b"]                 # (O,)
        O, _, _, k = w.shape
        tp = (W - k + 1) // POOL
        if tp <= 0:
            raise ValueError("degenerate branch: W too small for kernel/pool")
        ks.append(k)
        tps.append(tp)
        wall = jnp.transpose(w[:, :, 0, :], (2, 0, 1)).reshape(k * O, C)  # (k*O, C)
        if C_pad != C:
            wall = jnp.pad(wall, ((0, 0), (0, C_pad - C)))
        walls.append(wall)
        biases.append(bvec.reshape(O, 1))
    O = biases[0].shape[0]
    t_cat = sum(tps)
    HT = H * t_cat

    # Constant pooling + concat-placement matrices (structural, data independent):
    # pm[h*W + 8j + p, h*t_cat + off + j] = 1/8.
    offs = [0, tps[0], tps[0] + tps[1]]
    pmats = []
    for tp, off in zip(tps, offs):
        pm = np.zeros((HW, HT), np.float32)
        for h in range(H):
            for j in range(tp):
                pm[h * W + POOL * j: h * W + POOL * (j + 1),
                   h * t_cat + off + j] = 1.0 / POOL
        pmats.append(jnp.asarray(pm))

    gamma = params["bn_gamma"].reshape(O, 1)
    beta = params["bn_beta"].reshape(O, 1)

    kernel = functools.partial(_fused_kernel, ks=tuple(ks))

    in_specs = [pl.BlockSpec((1, C_pad, HW), lambda b: (b, 0, 0))]
    inputs = [x3]
    for wall, bias, pm in zip(walls, biases, pmats):
        in_specs += [pl.BlockSpec(wall.shape, lambda b: (0, 0)),
                     pl.BlockSpec(bias.shape, lambda b: (0, 0)),
                     pl.BlockSpec(pm.shape, lambda b: (0, 0))]
        inputs += [wall, bias, pm]
    in_specs += [pl.BlockSpec((O, 1), lambda b: (0, 0)),
                 pl.BlockSpec((O, 1), lambda b: (0, 0))]
    inputs += [gamma, beta]

    flops = 0
    for k in ks:
        flops += 2 * (k * O) * C_pad * HW      # conv matmul
        flops += k * O * HW                    # tap accumulation adds
        flops += 2 * O * HW * HT               # pool/placement matmul
    flops = B * flops + 6 * B * O * HT         # + batchnorm
    bytes_accessed = 4 * (int(x3.size) + B * O * HT
                          + sum(int(w.size) for w in walls)
                          + sum(int(p.size) for p in pmats)
                          + 5 * O)
    cost = pl.CostEstimate(flops=int(flops), transcendentals=int(O),
                           bytes_accessed=int(bytes_accessed))

    out3 = pl.pallas_call(
        kernel,
        out_shape=jax.ShapeDtypeStruct((B, O, HT), jnp.float32),
        grid=(B,),
        in_specs=in_specs,
        # Constant block index -> whole output resident in VMEM across the grid so
        # the last step can apply BatchNorm over the full batch before writeback.
        out_specs=pl.BlockSpec((B, O, HT), lambda b: (0, 0, 0)),
        compiler_params=pltpu.CompilerParams(
            # TODO(synk): the batch axis must stay sequential because the fused BN
            # finalize needs all batches; a v7x dual-TensorCore split would need a
            # cross-core partial-stats reduction.
            dimension_semantics=("arbitrary",)),
        cost_estimate=cost,
    )(*inputs)

    # (B, num_T, H*t_cat) -> (B, num_T, H, t_cat): trailing-dim split, metadata only.
    return out3.reshape(B, O, H, t_cat)


# ---------------------------------------------------------------------------
# Pure-JAX reference (independent check via lax.conv_general_dilated)
# ---------------------------------------------------------------------------
def reference(x_nchw, params):
    outs = []
    for name in ("conv1", "conv2", "conv3"):
        w = params[name + "_w"]
        b = params[name + "_b"]
        y = lax.conv_general_dilated(
            x_nchw, w, window_strides=(1, 1), padding="VALID",
            dimension_numbers=("NCHW", "OIHW", "NCHW"))
        y = y + b[None, :, None, None]
        y = jnp.where(y > 0, y, LEAKY_SLOPE * y)
        Bb, Oo, Hh, Tt = y.shape
        tp = Tt // POOL
        y = y[..., : tp * POOL].reshape(Bb, Oo, Hh, tp, POOL).mean(axis=-1)
        outs.append(y)
    out = jnp.concatenate(outs, axis=-1)
    mean = out.mean(axis=(0, 2, 3), keepdims=True)
    var = ((out - mean) ** 2).mean(axis=(0, 2, 3), keepdims=True)
    out = (out - mean) / jnp.sqrt(var + BN_EPS)
    g, be = params["bn_gamma"], params["bn_beta"]
    return out * g[None, :, None, None] + be[None, :, None, None]


if __name__ == "__main__":
    # Small shapes consistent with the module: in_channels=4, num_T=8, sampling_rate=64
    in_channels, num_T, sampling_rate = 4, 8, 64
    B, H, W = 2, 4, 64                                  # x is NCHW: (B, C, H_elec, W_time)

    key = jax.random.PRNGKey(0)
    keys = jax.random.split(key, 8)
    windows = [0.5, 0.25, 0.125]
    params = {}
    for i, frac in enumerate(windows):
        k = int(frac * sampling_rate)                   # 32, 16, 8
        params[f"conv{i + 1}_w"] = 0.1 * jax.random.normal(
            keys[i], (num_T, in_channels, 1, k), jnp.float32)
        params[f"conv{i + 1}_b"] = 0.1 * jax.random.normal(
            keys[i + 3], (num_T,), jnp.float32)
    params["bn_gamma"] = jnp.ones((num_T,), jnp.float32)   # fresh BatchNorm2d affine init
    params["bn_beta"] = jnp.zeros((num_T,), jnp.float32)

    x = jax.random.normal(keys[7], (B, in_channels, H, W), jnp.float32)

    out = jax.block_until_ready(temporal_inception_block(x, params))
    ref = jax.block_until_ready(reference(x, params))

    assert out.shape == ref.shape, (out.shape, ref.shape)
    if not jnp.allclose(out, ref, atol=1e-3, rtol=1e-3):
        raise AssertionError(
            f"mismatch: max abs diff = {float(jnp.max(jnp.abs(out - ref)))}")
    print("KERNEL_OK")
</pallas_src>

<mosaic_0001>
module attributes {stable_mosaic.version = 11 : i64} {
  func.func @_fused_kernel(%arg0: i32, %arg1: memref<1x8x256xf32, #tpu.memory_space<vmem>>, %arg2: memref<256x8xf32, #tpu.memory_space<vmem>>, %arg3: memref<8x1xf32, #tpu.memory_space<vmem>>, %arg4: memref<256x68xf32, #tpu.memory_space<vmem>>, %arg5: memref<128x8xf32, #tpu.memory_space<vmem>>, %arg6: memref<8x1xf32, #tpu.memory_space<vmem>>, %arg7: memref<256x68xf32, #tpu.memory_space<vmem>>, %arg8: memref<64x8xf32, #tpu.memory_space<vmem>>, %arg9: memref<8x1xf32, #tpu.memory_space<vmem>>, %arg10: memref<256x68xf32, #tpu.memory_space<vmem>>, %arg11: memref<8x1xf32, #tpu.memory_space<vmem>>, %arg12: memref<8x1xf32, #tpu.memory_space<vmem>>, %arg13: memref<2x8x68xf32, #tpu.memory_space<vmem>>) attributes {dimension_semantics = [#tpu.dimension_semantics<arbitrary>], iteration_bounds = array<i64: 2>, scalar_prefetch = 0 : i64, scratch_operands = 0 : i64, tpu.core_type = #tpu.core_type<tc>, window_params = [{transform_indices = @transform_0, window_bounds = array<i64: 1, 8, 256>}, {pipeline_mode = #tpu.pipeline_mode<synchronous>, transform_indices = @transform_1, window_bounds = array<i64: 256, 8>}, {pipeline_mode = #tpu.pipeline_mode<synchronous>, transform_indices = @transform_2, window_bounds = array<i64: 8, 1>}, {pipeline_mode = #tpu.pipeline_mode<synchronous>, transform_indices = @transform_3, window_bounds = array<i64: 256, 68>}, {pipeline_mode = #tpu.pipeline_mode<synchronous>, transform_indices = @transform_4, window_bounds = array<i64: 128, 8>}, {pipeline_mode = #tpu.pipeline_mode<synchronous>, transform_indices = @transform_5, window_bounds = array<i64: 8, 1>}, {pipeline_mode = #tpu.pipeline_mode<synchronous>, transform_indices = @transform_6, window_bounds = array<i64: 256, 68>}, {pipeline_mode = #tpu.pipeline_mode<synchronous>, transform_indices = @transform_7, window_bounds = array<i64: 64, 8>}, {pipeline_mode = #tpu.pipeline_mode<synchronous>, transform_indices = @transform_8, window_bounds = array<i64: 8, 1>}, {pipeline_mode = #tpu.pipeline_mode<synchronous>, transform_indices = @transform_9, window_bounds = array<i64: 256, 68>}, {pipeline_mode = #tpu.pipeline_mode<synchronous>, transform_indices = @transform_10, window_bounds = array<i64: 8, 1>}, {pipeline_mode = #tpu.pipeline_mode<synchronous>, transform_indices = @transform_11, window_bounds = array<i64: 8, 1>}, {pipeline_mode = #tpu.pipeline_mode<synchronous>, transform_indices = @transform_12, window_bounds = array<i64: 2, 8, 68>}]} {
    %c0 = arith.constant 0 : index
    %c0_0 = arith.constant 0 : index
    %c0_1 = arith.constant 0 : index
    %0 = vector.load %arg1[%c0, %c0_0, %c0_1] : memref<1x8x256xf32, #tpu.memory_space<vmem>>, vector<1x8x256xf32>
    %1 = vector.shape_cast %0 : vector<1x8x256xf32> to vector<8x256xf32>
    %c0_2 = arith.constant 0 : index
    %c0_3 = arith.constant 0 : index
    %2 = vector.load %arg2[%c0_2, %c0_3] : memref<256x8xf32, #tpu.memory_space<vmem>>, vector<256x8xf32>
    %cst = arith.constant dense<0.000000e+00> : vector<256x256xf32>
    %3 = tpu.matmul %2, %1, %cst {dimension_numbers = #tpu.dot_dimension_numbers<[1], [0], [0], [1], [0, 0, 1, 1], [], []>} : vector<256x8xf32>, vector<8x256xf32>, vector<256x256xf32> -> vector<256x256xf32>
    %c0_4 = arith.constant 0 : index
    %c0_5 = arith.constant 0 : index
    %4 = vector.load %arg3[%c0_4, %c0_5] : memref<8x1xf32, #tpu.memory_space<vmem>>, vector<8x1xf32>
    %5 = vector.extract_strided_slice %3 {offsets = [0, 0], sizes = [8, 256], strides = [1, 1]} : vector<256x256xf32> to vector<8x256xf32>
    %6 = vector.broadcast %4 : vector<8x1xf32> to vector<8x256xf32>
    %7 = arith.addf %6, %5 : vector<8x256xf32>
    %8 = vector.extract_strided_slice %3 {offsets = [8, 0], sizes = [8, 256], strides = [1, 1]} : vector<256x256xf32> to vector<8x256xf32>
    %c255_i32 = arith.constant 255 : i32
    %9 = tpu.dynamic_rotate %8 by %c255_i32 dim 1 : vector<8x256xf32>, i32 -> vector<8x256xf32>
    %10 = arith.addf %7, %9 : vector<8x256xf32>
    %11 = vector.extract_strided_slice %3 {offsets = [16, 0], sizes = [8, 256], strides = [1, 1]} : vector<256x256xf32> to vector<8x256xf32>
    %c254_i32 = arith.constant 254 : i32
    %12 = tpu.dynamic_rotate %11 by %c254_i32 dim 1 : vector<8x256xf32>, i32 -> vector<8x256xf32>
    %13 = arith.addf %10, %12 : vector<8x256xf32>
    %14 = vector.extract_strided_slice %3 {offsets = [24, 0], sizes = [8, 256], strides = [1, 1]} : vector<256x256xf32> to vector<8x256xf32>
    %c253_i32 = arith.constant 253 : i32
    %15 = tpu.dynamic_rotate %14 by %c253_i32 dim 1 : vector<8x256xf32>, i32 -> vector<8x256xf32>
    %16 = arith.addf %13, %15 : vector<8x256xf32>
    %17 = vector.extract_strided_slice %3 {offsets = [32, 0], sizes = [8, 256], strides = [1, 1]} : vector<256x256xf32> to vector<8x256xf32>
    %c252_i32 = arith.constant 252 : i32
    %18 = tpu.dynamic_rotate %17 by %c252_i32 dim 1 : vector<8x256xf32>, i32 -> vector<8x256xf32>
    %19 = arith.addf %16, %18 : vector<8x256xf32>
    %20 = vector.extract_strided_slice %3 {offsets = [40, 0], sizes = [8, 256], strides = [1, 1]} : vector<256x256xf32> to vector<8x256xf32>
    %c251_i32 = arith.constant 251 : i32
    %21 = tpu.dynamic_rotate %20 by %c251_i32 dim 1 : vector<8x256xf32>, i32 -> vector<8x256xf32>
    %22 = arith.addf %19, %21 : vector<8x256xf32>
    %23 = vector.extract_strided_slice %3 {offsets = [48, 0], sizes = [8, 256], strides = [1, 1]} : vector<256x256xf32> to vector<8x256xf32>
    %c250_i32 = arith.constant 250 : i32
    %24 = tpu.dynamic_rotate %23 by %c250_i32 dim 1 : vector<8x256xf32>, i32 -> vector<8x256xf32>
    %25 = arith.addf %22, %24 : vector<8x256xf32>
    %26 = vector.extract_strided_slice %3 {offsets = [56, 0], sizes = [8, 256], strides = [1, 1]} : vector<256x256xf32> to vector<8x256xf32>
    %c249_i32 = arith.constant 249 : i32
    %27 = tpu.dynamic_rotate %26 by %c249_i32 dim 1 : vector<8x256xf32>, i32 -> vector<8x256xf32>
    %28 = arith.addf %25, %27 : vector<8x256xf32>
    %29 = vector.extract_strided_slice %3 {offsets = [64, 0], sizes = [8, 256], strides = [1, 1]} : vector<256x256xf32> to vector<8x256xf32>
    %c248_i32 = arith.constant 248 : i32
    %30 = tpu.dynamic_rotate %29 by %c248_i32 dim 1 : vector<8x256xf32>, i32 -> vector<8x256xf32>
    %31 = arith.addf %28, %30 : vector<8x256xf32>
    %32 = vector.extract_strided_slice %3 {offsets = [72, 0], sizes = [8, 256], strides = [1, 1]} : vector<256x256xf32> to vector<8x256xf32>
    %c247_i32 = arith.constant 247 : i32
    %33 = tpu.dynamic_rotate %32 by %c247_i32 dim 1 : vector<8x256xf32>, i32 -> vector<8x256xf32>
    %34 = arith.addf %31, %33 : vector<8x256xf32>
    %35 = vector.extract_strided_slice %3 {offsets = [80, 0], sizes = [8, 256], strides = [1, 1]} : vector<256x256xf32> to vector<8x256xf32>
    %c246_i32 = arith.constant 246 : i32
    %36 = tpu.dynamic_rotate %35 by %c246_i32 dim 1 : vector<8x256xf32>, i32 -> vector<8x256xf32>
    %37 = arith.addf %34, %36 : vector<8x256xf32>
    %38 = vector.extract_strided_slice %3 {offsets = [88, 0], sizes = [8, 256], strides = [1, 1]} : vector<256x256xf32> to vector<8x256xf32>
    %c245_i32 = arith.constant 245 : i32
    %39 = tpu.dynamic_rotate %38 by %c245_i32 dim 1 : vector<8x256xf32>, i32 -> vector<8x256xf32>
    %40 = arith.addf %37, %39 : vector<8x256xf32>
    %41 = vector.extract_strided_slice %3 {offsets = [96, 0], sizes = [8, 256], strides = [1, 1]} : vector<256x256xf32> to vector<8x256xf32>
    %c244_i32 = arith.constant 244 : i32
    %42 = tpu.dynamic_rotate %41 by %c244_i32 dim 1 : vector<8x256xf32>, i32 -> vector<8x256xf32>
    %43 = arith.addf %40, %42 : vector<8x256xf32>
    %44 = vector.extract_strided_slice %3 {offsets = [104, 0], sizes = [8, 256], strides = [1, 1]} : vector<256x256xf32> to vector<8x256xf32>
    %c243_i32 = arith.constant 243 : i32
    %45 = tpu.dynamic_rotate %44 by %c243_i32 dim 1 : vector<8x256xf32>, i32 -> vector<8x256xf32>
    %46 = arith.addf %43, %45 : vector<8x256xf32>
    %47 = vector.extract_strided_slice %3 {offsets = [112, 0], sizes = [8, 256], strides = [1, 1]} : vector<256x256xf32> to vector<8x256xf32>
    %c242_i32 = arith.constant 242 : i32
    %48 = tpu.dynamic_rotate %47 by %c242_i32 dim 1 : vector<8x256xf32>, i32 -> vector<8x256xf32>
    %49 = arith.addf %46, %48 : vector<8x256xf32>
    %50 = vector.extract_strided_slice %3 {offsets = [120, 0], sizes = [8, 256], strides = [1, 1]} : vector<256x256xf32> to vector<8x256xf32>
    %c241_i32 = arith.constant 241 : i32
    %51 = tpu.dynamic_rotate %50 by %c241_i32 dim 1 : vector<8x256xf32>, i32 -> vector<8x256xf32>
    %52 = arith.addf %49, %51 : vector<8x256xf32>
    %53 = vector.extract_strided_slice %3 {offsets = [128, 0], sizes = [8, 256], strides = [1, 1]} : vector<256x256xf32> to vector<8x256xf32>
    %c240_i32 = arith.constant 240 : i32
    %54 = tpu.dynamic_rotate %53 by %c240_i32 dim 1 : vector<8x256xf32>, i32 -> vector<8x256xf32>
    %55 = arith.addf %52, %54 : vector<8x256xf32>
    %56 = vector.extract_strided_slice %3 {offsets = [136, 0], sizes = [8, 256], strides = [1, 1]} : vector<256x256xf32> to vector<8x256xf32>
    %c239_i32 = arith.constant 239 : i32
    %57 = tpu.dynamic_rotate %56 by %c239_i32 dim 1 : vector<8x256xf32>, i32 -> vector<8x256xf32>
    %58 = arith.addf %55, %57 : vector<8x256xf32>
    %59 = vector.extract_strided_slice %3 {offsets = [144, 0], sizes = [8, 256], strides = [1, 1]} : vector<256x256xf32> to vector<8x256xf32>
    %c238_i32 = arith.constant 238 : i32
    %60 = tpu.dynamic_rotate %59 by %c238_i32 dim 1 : vector<8x256xf32>, i32 -> vector<8x256xf32>
    %61 = arith.addf %58, %60 : vector<8x256xf32>
    %62 = vector.extract_strided_slice %3 {offsets = [152, 0], sizes = [8, 256], strides = [1, 1]} : vector<256x256xf32> to vector<8x256xf32>
    %c237_i32 = arith.constant 237 : i32
    %63 = tpu.dynamic_rotate %62 by %c237_i32 dim 1 : vector<8x256xf32>, i32 -> vector<8x256xf32>
    %64 = arith.addf %61, %63 : vector<8x256xf32>
    %65 = vector.extract_strided_slice %3 {offsets = [160, 0], sizes = [8, 256], strides = [1, 1]} : vector<256x256xf32> to vector<8x256xf32>
    %c236_i32 = arith.constant 236 : i32
    %66 = tpu.dynamic_rotate %65 by %c236_i32 dim 1 : vector<8x256xf32>, i32 -> vector<8x256xf32>
    %67 = arith.addf %64, %66 : vector<8x256xf32>
    %68 = vector.extract_strided_slice %3 {offsets = [168, 0], sizes = [8, 256], strides = [1, 1]} : vector<256x256xf32> to vector<8x256xf32>
    %c235_i32 = arith.constant 235 : i32
    %69 = tpu.dynamic_rotate %68 by %c235_i32 dim 1 : vector<8x256xf32>, i32 -> vector<8x256xf32>
    %70 = arith.addf %67, %69 : vector<8x256xf32>
    %71 = vector.extract_strided_slice %3 {offsets = [176, 0], sizes = [8, 256], strides = [1, 1]} : vector<256x256xf32> to vector<8x256xf32>
    %c234_i32 = arith.constant 234 : i32
    %72 = tpu.dynamic_rotate %71 by %c234_i32 dim 1 : vector<8x256xf32>, i32 -> vector<8x256xf32>
    %73 = arith.addf %70, %72 : vector<8x256xf32>
    %74 = vector.extract_strided_slice %3 {offsets = [184, 0], sizes = [8, 256], strides = [1, 1]} : vector<256x256xf32> to vector<8x256xf32>
    %c233_i32 = arith.constant 233 : i32
    %75 = tpu.dynamic_rotate %74 by %c233_i32 dim 1 : vector<8x256xf32>, i32 -> vector<8x256xf32>
    %76 = arith.addf %73, %75 : vector<8x256xf32>
    %77 = vector.extract_strided_slice %3 {offsets = [192, 0], sizes = [8, 256], strides = [1, 1]} : vector<256x256xf32> to vector<8x256xf32>
    %c232_i32 = arith.constant 232 : i32
    %78 = tpu.dynamic_rotate %77 by %c232_i32 dim 1 : vector<8x256xf32>, i32 -> vector<8x256xf32>
    %79 = arith.addf %76, %78 : vector<8x256xf32>
    %80 = vector.extract_strided_slice %3 {offsets = [200, 0], sizes = [8, 256], strides = [1, 1]} : vector<256x256xf32> to vector<8x256xf32>
    %c231_i32 = arith.constant 231 : i32
    %81 = tpu.dynamic_rotate %80 by %c231_i32 dim 1 : vector<8x256xf32>, i32 -> vector<8x256xf32>
    %82 = arith.addf %79, %81 : vector<8x256xf32>
    %83 = vector.extract_strided_slice %3 {offsets = [208, 0], sizes = [8, 256], strides = [1, 1]} : vector<256x256xf32> to vector<8x256xf32>
    %c230_i32 = arith.constant 230 : i32
    %84 = tpu.dynamic_rotate %83 by %c230_i32 dim 1 : vector<8x256xf32>, i32 -> vector<8x256xf32>
    %85 = arith.addf %82, %84 : vector<8x256xf32>
    %86 = vector.extract_strided_slice %3 {offsets = [216, 0], sizes = [8, 256], strides = [1, 1]} : vector<256x256xf32> to vector<8x256xf32>
    %c229_i32 = arith.constant 229 : i32
    %87 = tpu.dynamic_rotate %86 by %c229_i32 dim 1 : vector<8x256xf32>, i32 -> vector<8x256xf32>
    %88 = arith.addf %85, %87 : vector<8x256xf32>
    %89 = vector.extract_strided_slice %3 {offsets = [224, 0], sizes = [8, 256], strides = [1, 1]} : vector<256x256xf32> to vector<8x256xf32>
    %c228_i32 = arith.constant 228 : i32
    %90 = tpu.dynamic_rotate %89 by %c228_i32 dim 1 : vector<8x256xf32>, i32 -> vector<8x256xf32>
    %91 = arith.addf %88, %90 : vector<8x256xf32>
    %92 = vector.extract_strided_slice %3 {offsets = [232, 0], sizes = [8, 256], strides = [1, 1]} : vector<256x256xf32> to vector<8x256xf32>
    %c227_i32 = arith.constant 227 : i32
    %93 = tpu.dynamic_rotate %92 by %c227_i32 dim 1 : vector<8x256xf32>, i32 -> vector<8x256xf32>
    %94 = arith.addf %91, %93 : vector<8x256xf32>
    %95 = vector.extract_strided_slice %3 {offsets = [240, 0], sizes = [8, 256], strides = [1, 1]} : vector<256x256xf32> to vector<8x256xf32>
    %c226_i32 = arith.constant 226 : i32
    %96 = tpu.dynamic_rotate %95 by %c226_i32 dim 1 : vector<8x256xf32>, i32 -> vector<8x256xf32>
    %97 = arith.addf %94, %96 : vector<8x256xf32>
    %98 = vector.extract_strided_slice %3 {offsets = [248, 0], sizes = [8, 256], strides = [1, 1]} : vector<256x256xf32> to vector<8x256xf32>
    %c225_i32 = arith.constant 225 : i32
    %99 = tpu.dynamic_rotate %98 by %c225_i32 dim 1 : vector<8x256xf32>, i32 -> vector<8x256xf32>
    %100 = arith.addf %97, %99 : vector<8x256xf32>
    %cst_6 = arith.constant 0.000000e+00 : f32
    %101 = vector.broadcast %cst_6 : f32 to vector<8x256xf32>
    %102 = arith.cmpf ogt, %100, %101 : vector<8x256xf32>
    %cst_7 = arith.constant 0.00999999977 : f32
    %103 = vector.broadcast %cst_7 : f32 to vector<8x256xf32>
    %104 = arith.mulf %103, %100 : vector<8x256xf32>
    %105 = arith.select %102, %100, %104 : vector<8x256xi1>, vector<8x256xf32>
    %c0_8 = arith.constant 0 : index
    %c0_9 = arith.constant 0 : index
    %106 = vector.load %arg4[%c0_8, %c0_9] : memref<256x68xf32, #tpu.memory_space<vmem>>, vector<256x68xf32>
    %cst_10 = arith.constant dense<0.000000e+00> : vector<8x68xf32>
    %107 = tpu.matmul %105, %106, %cst_10 {dimension_numbers = #tpu.dot_dimension_numbers<[1], [0], [0], [1], [0, 0, 1, 1], [], []>} : vector<8x256xf32>, vector<256x68xf32>, vector<8x68xf32> -> vector<8x68xf32>
    %c0_11 = arith.constant 0 : index
    %c0_12 = arith.constant 0 : index
    %108 = vector.load %arg5[%c0_11, %c0_12] : memref<128x8xf32, #tpu.memory_space<vmem>>, vector<128x8xf32>
    %cst_13 = arith.constant dense<0.000000e+00> : vector<128x256xf32>
    %109 = tpu.matmul %108, %1, %cst_13 {dimension_numbers = #tpu.dot_dimension_numbers<[1], [0], [0], [1], [0, 0, 1, 1], [], []>} : vector<128x8xf32>, vector<8x256xf32>, vector<128x256xf32> -> vector<128x256xf32>
    %c0_14 = arith.constant 0 : index
    %c0_15 = arith.constant 0 : index
    %110 = vector.load %arg6[%c0_14, %c0_15] : memref<8x1xf32, #tpu.memory_space<vmem>>, vector<8x1xf32>
    %111 = vector.extract_strided_slice %109 {offsets = [0, 0], sizes = [8, 256], strides = [1, 1]} : vector<128x256xf32> to vector<8x256xf32>
    %112 = vector.broadcast %110 : vector<8x1xf32> to vector<8x256xf32>
    %113 = arith.addf %112, %111 : vector<8x256xf32>
    %114 = vector.extract_strided_slice %109 {offsets = [8, 0], sizes = [8, 256], strides = [1, 1]} : vector<128x256xf32> to vector<8x256xf32>
    %c255_i32_16 = arith.constant 255 : i32
    %115 = tpu.dynamic_rotate %114 by %c255_i32_16 dim 1 : vector<8x256xf32>, i32 -> vector<8x256xf32>
    %116 = arith.addf %113, %115 : vector<8x256xf32>
    %117 = vector.extract_strided_slice %109 {offsets = [16, 0], sizes = [8, 256], strides = [1, 1]} : vector<128x256xf32> to vector<8x256xf32>
    %c254_i32_17 = arith.constant 254 : i32
    %118 = tpu.dynamic_rotate %117 by %c254_i32_17 dim 1 : vector<8x256xf32>, i32 -> vector<8x256xf32>
    %119 = arith.addf %116, %118 : vector<8x256xf32>
    %120 = vector.extract_strided_slice %109 {offsets = [24, 0], sizes = [8, 256], strides = [1, 1]} : vector<128x256xf32> to vector<8x256xf32>
    %c253_i32_18 = arith.constant 253 : i32
    %121 = tpu.dynamic_rotate %120 by %c253_i32_18 dim 1 : vector<8x256xf32>, i32 -> vector<8x256xf32>
    %122 = arith.addf %119, %121 : vector<8x256xf32>
    %123 = vector.extract_strided_slice %109 {offsets = [32, 0], sizes = [8, 256], strides = [1, 1]} : vector<128x256xf32> to vector<8x256xf32>
    %c252_i32_19 = arith.constant 252 : i32
    %124 = tpu.dynamic_rotate %123 by %c252_i32_19 dim 1 : vector<8x256xf32>, i32 -> vector<8x256xf32>
    %125 = arith.addf %122, %124 : vector<8x256xf32>
    %126 = vector.extract_strided_slice %109 {offsets = [40, 0], sizes = [8, 256], strides = [1, 1]} : vector<128x256xf32> to vector<8x256xf32>
    %c251_i32_20 = arith.constant 251 : i32
    %127 = tpu.dynamic_rotate %126 by %c251_i32_20 dim 1 : vector<8x256xf32>, i32 -> vector<8x256xf32>
    %128 = arith.addf %125, %127 : vector<8x256xf32>
    %129 = vector.extract_strided_slice %109 {offsets = [48, 0], sizes = [8, 256], strides = [1, 1]} : vector<128x256xf32> to vector<8x256xf32>
    %c250_i32_21 = arith.constant 250 : i32
    %130 = tpu.dynamic_rotate %129 by %c250_i32_21 dim 1 : vector<8x256xf32>, i32 -> vector<8x256xf32>
    %131 = arith.addf %128, %130 : vector<8x256xf32>
    %132 = vector.extract_strided_slice %109 {offsets = [56, 0], sizes = [8, 256], strides = [1, 1]} : vector<128x256xf32> to vector<8x256xf32>
    %c249_i32_22 = arith.constant 249 : i32
    %133 = tpu.dynamic_rotate %132 by %c249_i32_22 dim 1 : vector<8x256xf32>, i32 -> vector<8x256xf32>
    %134 = arith.addf %131, %133 : vector<8x256xf32>
    %135 = vector.extract_strided_slice %109 {offsets = [64, 0], sizes = [8, 256], strides = [1, 1]} : vector<128x256xf32> to vector<8x256xf32>
    %c248_i32_23 = arith.constant 248 : i32
    %136 = tpu.dynamic_rotate %135 by %c248_i32_23 dim 1 : vector<8x256xf32>, i32 -> vector<8x256xf32>
    %137 = arith.addf %134, %136 : vector<8x256xf32>
    %138 = vector.extract_strided_slice %109 {offsets = [72, 0], sizes = [8, 256], strides = [1, 1]} : vector<128x256xf32> to vector<8x256xf32>
    %c247_i32_24 = arith.constant 247 : i32
    %139 = tpu.dynamic_rotate %138 by %c247_i32_24 dim 1 : vector<8x256xf32>, i32 -> vector<8x256xf32>
    %140 = arith.addf %137, %139 : vector<8x256xf32>
    %141 = vector.extract_strided_slice %109 {offsets = [80, 0], sizes = [8, 256], strides = [1, 1]} : vector<128x256xf32> to vector<8x256xf32>
    %c246_i32_25 = arith.constant 246 : i32
    %142 = tpu.dynamic_rotate %141 by %c246_i32_25 dim 1 : vector<8x256xf32>, i32 -> vector<8x256xf32>
    %143 = arith.addf %140, %142 : vector<8x256xf32>
    %144 = vector.extract_strided_slice %109 {offsets = [88, 0], sizes = [8, 256], strides = [1, 1]} : vector<128x256xf32> to vector<8x256xf32>
    %c245_i32_26 = arith.constant 245 : i32
    %145 = tpu.dynamic_rotate %144 by %c245_i32_26 dim 1 : vector<8x256xf32>, i32 -> vector<8x256xf32>
    %146 = arith.addf %143, %145 : vector<8x256xf32>
    %147 = vector.extract_strided_slice %109 {offsets = [96, 0], sizes = [8, 256], strides = [1, 1]} : vector<128x256xf32> to vector<8x256xf32>
    %c244_i32_27 = arith.constant 244 : i32
    %148 = tpu.dynamic_rotate %147 by %c244_i32_27 dim 1 : vector<8x256xf32>, i32 -> vector<8x256xf32>
    %149 = arith.addf %146, %148 : vector<8x256xf32>
    %150 = vector.extract_strided_slice %109 {offsets = [104, 0], sizes = [8, 256], strides = [1, 1]} : vector<128x256xf32> to vector<8x256xf32>
    %c243_i32_28 = arith.constant 243 : i32
    %151 = tpu.dynamic_rotate %150 by %c243_i32_28 dim 1 : vector<8x256xf32>, i32 -> vector<8x256xf32>
    %152 = arith.addf %149, %151 : vector<8x256xf32>
    %153 = vector.extract_strided_slice %109 {offsets = [112, 0], sizes = [8, 256], strides = [1, 1]} : vector<128x256xf32> to vector<8x256xf32>
    %c242_i32_29 = arith.constant 242 : i32
    %154 = tpu.dynamic_rotate %153 by %c242_i32_29 dim 1 : vector<8x256xf32>, i32 -> vector<8x256xf32>
    %155 = arith.addf %152, %154 : vector<8x256xf32>
    %156 = vector.extract_strided_slice %109 {offsets = [120, 0], sizes = [8, 256], strides = [1, 1]} : vector<128x256xf32> to vector<8x256xf32>
    %c241_i32_30 = arith.constant 241 : i32
    %157 = tpu.dynamic_rotate %156 by %c241_i32_30 dim 1 : vector<8x256xf32>, i32 -> vector<8x256xf32>
    %158 = arith.addf %155, %157 : vector<8x256xf32>
    %cst_31 = arith.constant 0.000000e+00 : f32
    %159 = vector.broadcast %cst_31 : f32 to vector<8x256xf32>
    %160 = arith.cmpf ogt, %158, %159 : vector<8x256xf32>
    %cst_32 = arith.constant 0.00999999977 : f32
    %161 = vector.broadcast %cst_32 : f32 to vector<8x256xf32>
    %162 = arith.mulf %161, %158 : vector<8x256xf32>
    %163 = arith.select %160, %158, %162 : vector<8x256xi1>, vector<8x256xf32>
    %c0_33 = arith.constant 0 : index
    %c0_34 = arith.constant 0 : index
    %164 = vector.load %arg7[%c0_33, %c0_34] : memref<256x68xf32, #tpu.memory_space<vmem>>, vector<256x68xf32>
    %cst_35 = arith.constant dense<0.000000e+00> : vector<8x68xf32>
    %165 = tpu.matmul %163, %164, %cst_35 {dimension_numbers = #tpu.dot_dimension_numbers<[1], [0], [0], [1], [0, 0, 1, 1], [], []>} : vector<8x256xf32>, vector<256x68xf32>, vector<8x68xf32> -> vector<8x68xf32>
    %166 = arith.addf %107, %165 : vector<8x68xf32>
    %c0_36 = arith.constant 0 : index
    %c0_37 = arith.constant 0 : index
    %167 = vector.load %arg8[%c0_36, %c0_37] : memref<64x8xf32, #tpu.memory_space<vmem>>, vector<64x8xf32>
    %cst_38 = arith.constant dense<0.000000e+00> : vector<64x256xf32>
    %168 = tpu.matmul %167, %1, %cst_38 {dimension_numbers = #tpu.dot_dimension_numbers<[1], [0], [0], [1], [0, 0, 1, 1], [], []>} : vector<64x8xf32>, vector<8x256xf32>, vector<64x256xf32> -> vector<64x256xf32>
    %c0_39 = arith.constant 0 : index
    %c0_40 = arith.constant 0 : index
    %169 = vector.load %arg9[%c0_39, %c0_40] : memref<8x1xf32, #tpu.memory_space<vmem>>, vector<8x1xf32>
    %170 = vector.extract_strided_slice %168 {offsets = [0, 0], sizes = [8, 256], strides = [1, 1]} : vector<64x256xf32> to vector<8x256xf32>
    %171 = vector.broadcast %169 : vector<8x1xf32> to vector<8x256xf32>
    %172 = arith.addf %171, %170 : vector<8x256xf32>
    %173 = vector.extract_strided_slice %168 {offsets = [8, 0], sizes = [8, 256], strides = [1, 1]} : vector<64x256xf32> to vector<8x256xf32>
    %c255_i32_41 = arith.constant 255 : i32
    %174 = tpu.dynamic_rotate %173 by %c255_i32_41 dim 1 : vector<8x256xf32>, i32 -> vector<8x256xf32>
    %175 = arith.addf %172, %174 : vector<8x256xf32>
    %176 = vector.extract_strided_slice %168 {offsets = [16, 0], sizes = [8, 256], strides = [1, 1]} : vector<64x256xf32> to vector<8x256xf32>
    %c254_i32_42 = arith.constant 254 : i32
    %177 = tpu.dynamic_rotate %176 by %c254_i32_42 dim 1 : vector<8x256xf32>, i32 -> vector<8x256xf32>
    %178 = arith.addf %175, %177 : vector<8x256xf32>
    %179 = vector.extract_strided_slice %168 {offsets = [24, 0], sizes = [8, 256], strides = [1, 1]} : vector<64x256xf32> to vector<8x256xf32>
    %c253_i32_43 = arith.constant 253 : i32
    %180 = tpu.dynamic_rotate %179 by %c253_i32_43 dim 1 : vector<8x256xf32>, i32 -> vector<8x256xf32>
    %181 = arith.addf %178, %180 : vector<8x256xf32>
    %182 = vector.extract_strided_slice %168 {offsets = [32, 0], sizes = [8, 256], strides = [1, 1]} : vector<64x256xf32> to vector<8x256xf32>
    %c252_i32_44 = arith.constant 252 : i32
    %183 = tpu.dynamic_rotate %182 by %c252_i32_44 dim 1 : vector<8x256xf32>, i32 -> vector<8x256xf32>
    %184 = arith.addf %181, %183 : vector<8x256xf32>
    %185 = vector.extract_strided_slice %168 {offsets = [40, 0], sizes = [8, 256], strides = [1, 1]} : vector<64x256xf32> to vector<8x256xf32>
    %c251_i32_45 = arith.constant 251 : i32
    %186 = tpu.dynamic_rotate %185 by %c251_i32_45 dim 1 : vector<8x256xf32>, i32 -> vector<8x256xf32>
    %187 = arith.addf %184, %186 : vector<8x256xf32>
    %188 = vector.extract_strided_slice %168 {offsets = [48, 0], sizes = [8, 256], strides = [1, 1]} : vector<64x256xf32> to vector<8x256xf32>
    %c250_i32_46 = arith.constant 250 : i32
    %189 = tpu.dynamic_rotate %188 by %c250_i32_46 dim 1 : vector<8x256xf32>, i32 -> vector<8x256xf32>
    %190 = arith.addf %187, %189 : vector<8x256xf32>
    %191 = vector.extract_strided_slice %168 {offsets = [56, 0], sizes = [8, 256], strides = [1, 1]} : vector<64x256xf32> to vector<8x256xf32>
    %c249_i32_47 = arith.constant 249 : i32
    %192 = tpu.dynamic_rotate %191 by %c249_i32_47 dim 1 : vector<8x256xf32>, i32 -> vector<8x256xf32>
    %193 = arith.addf %190, %192 : vector<8x256xf32>
    %cst_48 = arith.constant 0.000000e+00 : f32
    %194 = vector.broadcast %cst_48 : f32 to vector<8x256xf32>
    %195 = arith.cmpf ogt, %193, %194 : vector<8x256xf32>
    %cst_49 = arith.constant 0.00999999977 : f32
    %196 = vector.broadcast %cst_49 : f32 to vector<8x256xf32>
    %197 = arith.mulf %196, %193 : vector<8x256xf32>
    %198 = arith.select %195, %193, %197 : vector<8x256xi1>, vector<8x256xf32>
    %c0_50 = arith.constant 0 : index
    %c0_51 = arith.constant 0 : index
    %199 = vector.load %arg10[%c0_50, %c0_51] : memref<256x68xf32, #tpu.memory_space<vmem>>, vector<256x68xf32>
    %cst_52 = arith.constant dense<0.000000e+00> : vector<8x68xf32>
    %200 = tpu.matmul %198, %199, %cst_52 {dimension_numbers = #tpu.dot_dimension_numbers<[1], [0], [0], [1], [0, 0, 1, 1], [], []>} : vector<8x256xf32>, vector<256x68xf32>, vector<8x68xf32> -> vector<8x68xf32>
    %201 = arith.addf %166, %200 : vector<8x68xf32>
    %202 = arith.index_cast %arg0 : i32 to index
    %c0_53 = arith.constant 0 : index
    %c0_54 = arith.constant 0 : index
    %203 = vector.load %arg13[%202, %c0_53, %c0_54] : memref<2x8x68xf32, #tpu.memory_space<vmem>>, vector<1x8x68xf32>
    %204 = vector.shape_cast %203 : vector<1x8x68xf32> to vector<8x68xf32>
    %205 = vector.shape_cast %201 : vector<8x68xf32> to vector<1x8x68xf32>
    tpu.vector_store %arg13[%202, %c0_53, %c0_54], %205 {strides = array<i32>} : memref<2x8x68xf32, #tpu.memory_space<vmem>>, vector<1x8x68xf32>,
    %c1_i32 = arith.constant 1 : i32
    %206 = arith.cmpi eq, %arg0, %c1_i32 : i32
    %207 = arith.extui %206 : i1 to i32
    %c0_i32 = arith.constant 0 : i32
    %208 = arith.cmpi ne, %207, %c0_i32 : i32
    scf.if %208 {
      %c0_55 = arith.constant 0 : index
      %c0_56 = arith.constant 0 : index
      %c0_57 = arith.constant 0 : index
      %209 = vector.load %arg13[%c0_55, %c0_56, %c0_57] : memref<2x8x68xf32, #tpu.memory_space<vmem>>, vector<2x8x68xf32>
      %cst_58 = arith.constant dense<0.000000e+00> : vector<8x68xf32>
      %210 = vector.multi_reduction <add>, %209, %cst_58 [0] : vector<2x8x68xf32> to vector<8x68xf32>
      %cst_59 = arith.constant dense<0.000000e+00> : vector<8xf32>
      %211 = vector.multi_reduction <add>, %210, %cst_59 [1] : vector<8x68xf32> to vector<8xf32>
      %212 = vector.shape_cast %211 : vector<8xf32> to vector<8x1xf32>
      %cst_60 = arith.constant 1.360000e+02 : f32
      %213 = vector.broadcast %cst_60 : f32 to vector<8x1xf32>
      %214 = arith.divf %212, %213 : vector<8x1xf32>
      %215 = vector.shape_cast %214 : vector<8x1xf32> to vector<1x8x1xf32>
      %216 = vector.broadcast %215 : vector<1x8x1xf32> to vector<2x8x68xf32>
      %217 = arith.subf %209, %216 : vector<2x8x68xf32>
      %218 = arith.mulf %217, %217 : vector<2x8x68xf32>
      %cst_61 = arith.constant dense<0.000000e+00> : vector<8x68xf32>
      %219 = vector.multi_reduction <add>, %218, %cst_61 [0] : vector<2x8x68xf32> to vector<8x68xf32>
      %cst_62 = arith.constant dense<0.000000e+00> : vector<8xf32>
      %220 = vector.multi_reduction <add>, %219, %cst_62 [1] : vector<8x68xf32> to vector<8xf32>
      %221 = vector.shape_cast %220 : vector<8xf32> to vector<8x1xf32>
      %cst_63 = arith.constant 1.360000e+02 : f32
      %222 = vector.broadcast %cst_63 : f32 to vector<8x1xf32>
      %223 = arith.divf %221, %222 : vector<8x1xf32>
      %cst_64 = arith.constant 9.99999974E-6 : f32
      %224 = vector.broadcast %cst_64 : f32 to vector<8x1xf32>
      %225 = arith.addf %223, %224 : vector<8x1xf32>
      %226 = math.rsqrt %225 : vector<8x1xf32>
      %227 = vector.shape_cast %226 : vector<8x1xf32> to vector<1x8x1xf32>
      %228 = vector.broadcast %227 : vector<1x8x1xf32> to vector<2x8x68xf32>
      %229 = arith.mulf %217, %228 : vector<2x8x68xf32>
      %c0_65 = arith.constant 0 : index
      %c0_66 = arith.constant 0 : index
      %230 = vector.load %arg11[%c0_65, %c0_66] : memref<8x1xf32, #tpu.memory_space<vmem>>, vector<8x1xf32>
      %231 = vector.shape_cast %230 : vector<8x1xf32> to vector<1x8x1xf32>
      %232 = vector.broadcast %231 : vector<1x8x1xf32> to vector<2x8x68xf32>
      %233 = arith.mulf %229, %232 : vector<2x8x68xf32>
      %c0_67 = arith.constant 0 : index
      %c0_68 = arith.constant 0 : index
      %234 = vector.load %arg12[%c0_67, %c0_68] : memref<8x1xf32, #tpu.memory_space<vmem>>, vector<8x1xf32>
      %235 = vector.shape_cast %234 : vector<8x1xf32> to vector<1x8x1xf32>
      %236 = vector.broadcast %235 : vector<1x8x1xf32> to vector<2x8x68xf32>
      %237 = arith.addf %233, %236 : vector<2x8x68xf32>
      %c0_69 = arith.constant 0 : index
      %c0_70 = arith.constant 0 : index
      %c0_71 = arith.constant 0 : index
      %238 = vector.load %arg13[%c0_69, %c0_70, %c0_71] : memref<2x8x68xf32, #tpu.memory_space<vmem>>, vector<2x8x68xf32>
      tpu.vector_store %arg13[%c0_69, %c0_70, %c0_71], %237 {strides = array<i32>} : memref<2x8x68xf32, #tpu.memory_space<vmem>>, vector<2x8x68xf32>,
    } else {
    }
    return
  }
  func.func @transform_0(%arg0: i32) -> (i32, i32, i32) {
    %c0_i32 = arith.constant 0 : i32
    %c0_i32_0 = arith.constant 0 : i32
    %c0_i32_1 = arith.constant 0 : i32
    return %arg0, %c0_i32, %c0_i32_0 : i32, i32, i32
  }
  func.func @transform_1(%arg0: i32) -> (i32, i32) {
    %c0_i32 = arith.constant 0 : i32
    %c0_i32_0 = arith.constant 0 : i32
    %c0_i32_1 = arith.constant 0 : i32
    return %c0_i32, %c0_i32_0 : i32, i32
  }
  func.func @transform_2(%arg0: i32) -> (i32, i32) {
    %c0_i32 = arith.constant 0 : i32
    %c0_i32_0 = arith.constant 0 : i32
    %c0_i32_1 = arith.constant 0 : i32
    return %c0_i32, %c0_i32_0 : i32, i32
  }
  func.func @transform_3(%arg0: i32) -> (i32, i32) {
    %c0_i32 = arith.constant 0 : i32
    %c0_i32_0 = arith.constant 0 : i32
    %c0_i32_1 = arith.constant 0 : i32
    return %c0_i32, %c0_i32_0 : i32, i32
  }
  func.func @transform_4(%arg0: i32) -> (i32, i32) {
    %c0_i32 = arith.constant 0 : i32
    %c0_i32_0 = arith.constant 0 : i32
    %c0_i32_1 = arith.constant 0 : i32
    return %c0_i32, %c0_i32_0 : i32, i32
  }
  func.func @transform_5(%arg0: i32) -> (i32, i32) {
    %c0_i32 = arith.constant 0 : i32
    %c0_i32_0 = arith.constant 0 : i32
    %c0_i32_1 = arith.constant 0 : i32
    return %c0_i32, %c0_i32_0 : i32, i32
  }
  func.func @transform_6(%arg0: i32) -> (i32, i32) {
    %c0_i32 = arith.constant 0 : i32
    %c0_i32_0 = arith.constant 0 : i32
    %c0_i32_1 = arith.constant 0 : i32
    return %c0_i32, %c0_i32_0 : i32, i32
  }
  func.func @transform_7(%arg0: i32) -> (i32, i32) {
    %c0_i32 = arith.constant 0 : i32
    %c0_i32_0 = arith.constant 0 : i32
    %c0_i32_1 = arith.constant 0 : i32
    return %c0_i32, %c0_i32_0 : i32, i32
  }
  func.func @transform_8(%arg0: i32) -> (i32, i32) {
    %c0_i32 = arith.constant 0 : i32
    %c0_i32_0 = arith.constant 0 : i32
    %c0_i32_1 = arith.constant 0 : i32
    return %c0_i32, %c0_i32_0 : i32, i32
  }
  func.func @transform_9(%arg0: i32) -> (i32, i32) {
    %c0_i32 = arith.constant 0 : i32
    %c0_i32_0 = arith.constant 0 : i32
    %c0_i32_1 = arith.constant 0 : i32
    return %c0_i32, %c0_i32_0 : i32, i32
  }
  func.func @transform_10(%arg0: i32) -> (i32, i32) {
    %c0_i32 = arith.constant 0 : i32
    %c0_i32_0 = arith.constant 0 : i32
    %c0_i32_1 = arith.constant 0 : i32
    return %c0_i32, %c0_i32_0 : i32, i32
  }
  func.func @transform_11(%arg0: i32) -> (i32, i32) {
    %c0_i32 = arith.constant 0 : i32
    %c0_i32_0 = arith.constant 0 : i32
    %c0_i32_1 = arith.constant 0 : i32
    return %c0_i32, %c0_i32_0 : i32, i32
  }
  func.func @transform_12(%arg0: i32) -> (i32, i32, i32) {
    %c0_i32 = arith.constant 0 : i32
    %c0_i32_0 = arith.constant 0 : i32
    %c0_i32_1 = arith.constant 0 : i32
    %c0_i32_2 = arith.constant 0 : i32
    return %c0_i32, %c0_i32_0, %c0_i32_1 : i32, i32, i32
  }
}

</mosaic_0001>

<bundles_post_ra>
// kernel: tpu_custom_call.1
= control target key start
LH: loop header
LB: loop body
LE: loop exit
PB: predicated region body
PF: predicated region fallthrough
CT: control target
= control target key end

     0   :  { %17 = vsyncpa [#allocation3], 0  ;;  %s2229_s21 = smov 0   ;;  %s3312_s0 = inlined_call_operand.vmem [shape: f32[2,8,256], index: 0, kind: input, shape index: {}]   ;;  %s3313_s1 = inlined_call_operand.vmem [shape: f32[256,8], index: 1, kind: input, shape index: {}]   ;;  %s3314_s2 = inlined_call_operand.vmem [shape: f32[8,1], index: 2, kind: input, shape index: {}]   ;;  %s3315_s3 = inlined_call_operand.vmem [shape: f32[256,68], index: 3, kind: input, shape index: {}]   ;;  %s3316_s4 = inlined_call_operand.vmem [shape: f32[128,8], index: 4, kind: input, shape index: {}]   ;;  %s3317_s5 = inlined_call_operand.vmem [shape: f32[8,1], index: 5, kind: input, shape index: {}]   ;;  %s3318_s6 = inlined_call_operand.vmem [shape: f32[256,68], index: 6, kind: input, shape index: {}]   ;;  %s3319_s7 = inlined_call_operand.vmem [shape: f32[64,8], index: 7, kind: input, shape index: {}]   ;;  %s3320_s8 = inlined_call_operand.vmem [shape: f32[8,1], index: 8, kind: input, shape index: {}]   ;;  %s3321_s9 = inlined_call_operand.vmem [shape: f32[256,68], index: 9, kind: input, shape index: {}]   ;;  %s3322_s10 = inlined_call_operand.vmem [shape: f32[8,1], index: 10, kind: input, shape index: {}]   ;;  %s3323_s11 = inlined_call_operand.vmem [shape: f32[8,1], index: 11, kind: input, shape index: {}]   ;;  %s3324_s12 = inlined_call_operand.hbm [shape: f32[2,8,68], index: 12, kind: output, shape index: {}]  }
   0x1 LB: > { %s2235_s22 = sadd.s32 4294967295, %s2125_s21   ;;  %p1902_p0 = scmp.ge.s32.totalorder %s2125_s21, 1  ;;  %s2125_s21 = sphi %s2229_s21, %s23_s21  }
   0x2   : > { %p358_p1 = scmp.lt.s32.totalorder %s2125_s21, 3 }
   0x4   : > { %p359_p2 = pnand %p1902_p0, %p358_p1 }
   0x5   : > { %p395_p3 = scmp.lt.s32.totalorder (!%p359_p2), %s2235_s22, 1  ;;  %s2128_s26 = smov (!%p359_p2), 127  }
   0x6   : > { %362 = sbr.rel (%p359_p2) target bundleno = 1264 (0x4f0), region = 68  ;;  %s2129_s29 = smov (!%p359_p2), 126  }
   0x7   : > { %s2130_s15 = smov (!%p359_p2), 125   ;;  %s3331_s18 = smov (!%p359_p2), 124  }
   0x8   : > { %s3327_s30 = smov (!%p359_p2), 122   ;;  %s3325_s17 = smov (!%p359_p2), 121  }
   0x9   : > { %s2135_s27 = smov (!%p359_p2), 120   ;;  %s2136_s16 = smov (!%p359_p2), 119  }
   0xa   : > { %s2137_s23 = smov (!%p359_p2), 118   ;;  %s2138_s20 = smov (!%p359_p2), 117  }
   0xb   : > { %v2127_v0 = vmov 0   ;;  %v757_v1 = vld [vmem:[%s3314_s2] sm:$0xff]  ;;  %s396_s25 = scalar_select %p395_p3, %s2235_s22, 1  ;;  %vm434_vm0 = vcmask 64512   ;;  %v433_v6 = vld [vmem:[%s3313_s1 + $0xf8] sm:$0xff]  ;;  %v403_v7 = vld [vmem:[%s3313_s1 + $0x8] sm:$0xff] }
   0xc   : > { %2077 = vset.pattern.permute.xlu0 %v2127_v0  ;;  %2078 = vset.pattern.permute.xlu1 %v2127_v0  ;;  %v1278_v2 = vld [vmem:[%s3317_s5] sm:$0xff]  ;;  %v404_v9 = vld [vmem:[%s3313_s1 + $0x10] sm:$0xff]  ;;  %v1085_v10 = vld [vmem:[%s3316_s4 + $0x8] sm:$0xff]  ;;  %s2142_s24 = smov 113   ;;  %s2144_s14 = smov 111  }
   0xd   : > { %760 = vperm.xlu0 %2077, %v757_v1   ;;  %s2023_s28 = sshll.u32 %s396_s25, 4  ;;  %1281 = vperm.xlu1 %2078, %v1278_v2   ;;  %v402_v3 = vld [vmem:[%s3313_s1] sm:$0xff]  ;;  %v405_v11 = vld [vmem:[%s3313_s1 + $0x18] sm:$0xff]  ;;  %v1086_v12 = vld [vmem:[%s3316_s4 + $0x10] sm:$0xff]  ;;  %s3329_s25 = smov 123  }
   0xe   : > { %s2250_s13 = scalar_lea.vmem %s3312_s0, %s2023_s28  ;;  %v1084_v8 = vld [vmem:[%s3316_s4] sm:$0xff]  ;;  %v1087_v14 = vld [vmem:[%s3316_s4 + $0x18] sm:$0xff]  ;;  %v407_v15 = vld [vmem:[%s3313_s1 + $0x28] sm:$0xff]  ;;  %s2143_s28 = smov 112  }
   0xf   : > { %v400_v4 = vld [vmem:[%s2250_s13] sm:$0xff]  ;;  %v401_v5 = vld [vmem:[%s2250_s13 + $0x8] sm:$0xff]  ;;  %v408_v17 = vld [vmem:[%s3313_s1 + $0x30] sm:$0xff]  ;;  %s2145_s19 = smov 110   ;;  %p2018_p4 = scmp.ne.s32.totalorder %s2235_s22, 1 }
  0x10   : > { %546 = vmatpush.msra.mxu0 %v400_v4  ;;  %659 = vmatpush.msra.mxu1 %v401_v5  ;;  %v406_v13 = vld [vmem:[%s3313_s1 + $0x20] sm:$0xff]  ;;  %v1089_v18 = vld [vmem:[%s3316_s4 + $0x28] sm:$0xff]  ;;  %v409_v19 = vld [vmem:[%s3313_s1 + $0x38] sm:$0xff] }
  0x11   : > { %1905 = vmatmul.msk.f32.vlgmr.msra.gmra.mxu0 %vm434_vm0, %v402_v3  ;;  %1937 = vmatmul.msk.f32.vlgmr.msra.gmra.mxu1 %vm434_vm0, %v402_v3  ;;  %v1088_v16 = vld [vmem:[%s3316_s4 + $0x20] sm:$0xff]  ;;  %v1090_v20 = vld [vmem:[%s3316_s4 + $0x30] sm:$0xff]  ;;  %v1091_v22 = vld [vmem:[%s3316_s4 + $0x38] sm:$0xff] }
  0x12   : > { %2024 = vmatpush.msra.mxu2 %v400_v4  ;;  %2025 = vmatpush.msra.mxu3 %v401_v5  ;;  %v410_v21 = vld [vmem:[%s3313_s1 + $0x40] sm:$0xff]  ;;  %v411_v23 = vld [vmem:[%s3313_s1 + $0x48] sm:$0xff]  ;;  %v412_v25 = vld [vmem:[%s3313_s1 + $0x50] sm:$0xff] }
  0x13   : > { %1936 = vmatmul.msk.f32.vlgmr.msra.gmra.mxu2 %vm434_vm0, %v433_v6  ;;  %1968 = vmatmul.msk.f32.vlgmr.msra.gmra.mxu3 %vm434_vm0, %v433_v6  ;;  %v1092_v24 = vld [vmem:[%s3316_s4 + $0x40] sm:$0xff]  ;;  %v1093_v26 = vld [vmem:[%s3316_s4 + $0x48] sm:$0xff]  ;;  %v413_v27 = vld [vmem:[%s3313_s1 + $0x58] sm:$0xff] }
  0x14   : > { %1163 = vmatpush.msrb.mxu2 %v400_v4  ;;  %1228 = vmatpush.msrb.mxu3 %v401_v5  ;;  %v1094_v28 = vld [vmem:[%s3316_s4 + $0x50] sm:$0xff]  ;;  %v414_v29 = vld [vmem:[%s3313_s1 + $0x60] sm:$0xff]  ;;  %v1095_v30 = vld [vmem:[%s3316_s4 + $0x58] sm:$0xff] }
  0x15   : > { %v415_v31 = vld [vmem:[%s3313_s1 + $0x68] sm:$0xff]  ;;  %v1096_v32 = vld [vmem:[%s3316_s4 + $0x60] sm:$0xff]  ;;  %v416_v33 = vld [vmem:[%s3313_s1 + $0x70] sm:$0xff] }
  0x16   : > { %v1097_v34 = vld [vmem:[%s3316_s4 + $0x68] sm:$0xff]  ;;  %v417_v35 = vld [vmem:[%s3313_s1 + $0x78] sm:$0xff]  ;;  %v1098_v36 = vld [vmem:[%s3316_s4 + $0x70] sm:$0xff] }
  0x17   : > { %v418_v39 = vld [vmem:[%s3313_s1 + $0x80] sm:$0xff]  ;;  %v1099_v40 = vld [vmem:[%s3316_s4 + $0x78] sm:$0xff]  ;;  %v419_v43 = vld [vmem:[%s3313_s1 + $0x88] sm:$0xff] }
  0x18   : > { %v420_v48 = vld [vmem:[%s3313_s1 + $0x90] sm:$0xff]  ;;  %v421_v53 = vld [vmem:[%s3313_s1 + $0x98] sm:$0xff]  ;;  %v422_v58 = vld [vmem:[%s3313_s1 + $0xa0] sm:$0xff] }
  0x19   : > { %1906 = vmatmul.msk.f32.gmra.mxu0 %vm434_vm0, %v403_v7  ;;  %1938 = vmatmul.msk.f32.gmra.mxu1 %vm434_vm0, %v403_v7  ;;  %v423_v63 = vld [vmem:[%s3313_s1 + $0xa8] sm:$0xff]  ;;  %v424_v3 = vld [vmem:[%s3313_s1 + $0xb0] sm:$0xff] }
  0x1b   : > { %1969 = vmatmul.msk.f32.vlgmr.msrb.gmra.mxu2 %vm434_vm0, %v1084_v8  ;;  %1985 = vmatmul.msk.f32.vlgmr.msrb.gmra.mxu3 %vm434_vm0, %v1084_v8  ;;  %v425_v8 = vld [vmem:[%s3313_s1 + $0xb8] sm:$0xff] }
  0x21   : > { %1907 = vmatmul.msk.f32.gmra.mxu0 %vm434_vm0, %v404_v9  ;;  %1939 = vmatmul.msk.f32.gmra.mxu1 %vm434_vm0, %v404_v9 }
  0x23   : > { %1970 = vmatmul.msk.f32.gmra.mxu2 %vm434_vm0, %v1085_v10  ;;  %1986 = vmatmul.msk.f32.gmra.mxu3 %vm434_vm0, %v1085_v10 }
  0x29   : > { %1908 = vmatmul.msk.f32.gmra.mxu0 %vm434_vm0, %v405_v11  ;;  %1940 = vmatmul.msk.f32.gmra.mxu1 %vm434_vm0, %v405_v11 }
  0x2b   : > { %1971 = vmatmul.msk.f32.gmra.mxu2 %vm434_vm0, %v1086_v12  ;;  %1987 = vmatmul.msk.f32.gmra.mxu3 %vm434_vm0, %v1086_v12 }
  0x31   : > { %1909 = vmatmul.msk.f32.gmra.mxu0 %vm434_vm0, %v406_v13  ;;  %1941 = vmatmul.msk.f32.gmra.mxu1 %vm434_vm0, %v406_v13  ;;  %v426_v13 = vld [vmem:[%s3313_s1 + $0xc0] sm:$0xff] }
  0x33   : > { %1972 = vmatmul.msk.f32.gmra.mxu2 %vm434_vm0, %v1087_v14  ;;  %1988 = vmatmul.msk.f32.gmra.mxu3 %vm434_vm0, %v1087_v14 }
  0x39   : > { %1910 = vmatmul.msk.f32.gmra.mxu0 %vm434_vm0, %v407_v15  ;;  %1942 = vmatmul.msk.f32.gmra.mxu1 %vm434_vm0, %v407_v15 }
  0x3b   : > { %1973 = vmatmul.msk.f32.gmra.mxu2 %vm434_vm0, %v1088_v16  ;;  %1989 = vmatmul.msk.f32.gmra.mxu3 %vm434_vm0, %v1088_v16 }
  0x41   : > { %1911 = vmatmul.msk.f32.gmra.mxu0 %vm434_vm0, %v408_v17  ;;  %1943 = vmatmul.msk.f32.gmra.mxu1 %vm434_vm0, %v408_v17 }
  0x43   : > { %1974 = vmatmul.msk.f32.gmra.mxu2 %vm434_vm0, %v1089_v18  ;;  %1990 = vmatmul.msk.f32.gmra.mxu3 %vm434_vm0, %v1089_v18  ;;  %v427_v18 = vld [vmem:[%s3313_s1 + $0xc8] sm:$0xff] }
  0x49   : > { %1912 = vmatmul.msk.f32.gmra.mxu0 %vm434_vm0, %v409_v19  ;;  %1944 = vmatmul.msk.f32.gmra.mxu1 %vm434_vm0, %v409_v19 }
  0x4b   : > { %1975 = vmatmul.msk.f32.gmra.mxu2 %vm434_vm0, %v1090_v20  ;;  %1991 = vmatmul.msk.f32.gmra.mxu3 %vm434_vm0, %v1090_v20 }
  0x51   : > { %1913 = vmatmul.msk.f32.gmra.mxu0 %vm434_vm0, %v410_v21  ;;  %1945 = vmatmul.msk.f32.gmra.mxu1 %vm434_vm0, %v410_v21 }
  0x53   : > { %1976 = vmatmul.msk.f32.gmra.mxu2 %vm434_vm0, %v1091_v22  ;;  %1992 = vmatmul.msk.f32.gmra.mxu3 %vm434_vm0, %v1091_v22  ;;  %v428_v22 = vld [vmem:[%s3313_s1 + $0xd0] sm:$0xff] }
  0x59   : > { %1914 = vmatmul.msk.f32.gmra.mxu0 %vm434_vm0, %v411_v23  ;;  %1946 = vmatmul.msk.f32.gmra.mxu1 %vm434_vm0, %v411_v23 }
  0x5b   : > { %1977 = vmatmul.msk.f32.gmra.mxu2 %vm434_vm0, %v1092_v24  ;;  %1993 = vmatmul.msk.f32.gmra.mxu3 %vm434_vm0, %v1092_v24 }
  0x61   : > { %1915 = vmatmul.msk.f32.gmra.mxu0 %vm434_vm0, %v412_v25  ;;  %1947 = vmatmul.msk.f32.gmra.mxu1 %vm434_vm0, %v412_v25 }
  0x63   : > { %1978 = vmatmul.msk.f32.gmra.mxu2 %vm434_vm0, %v1093_v26  ;;  %1994 = vmatmul.msk.f32.gmra.mxu3 %vm434_vm0, %v1093_v26  ;;  %v429_v26 = vld [vmem:[%s3313_s1 + $0xd8] sm:$0xff] }
  0x69   : > { %1916 = vmatmul.msk.f32.gmra.mxu0 %vm434_vm0, %v413_v27  ;;  %1948 = vmatmul.msk.f32.gmra.mxu1 %vm434_vm0, %v413_v27 }
  0x6b   : > { %1995 = vmatmul.msk.f32.gmra.mxu3 %vm434_vm0, %v1094_v28  ;;  %1979 = vmatmul.msk.f32.gmra.mxu2 %vm434_vm0, %v1094_v28 }
  0x71   : > { %1917 = vmatmul.msk.f32.gmra.mxu0 %vm434_vm0, %v414_v29  ;;  %1949 = vmatmul.msk.f32.gmra.mxu1 %vm434_vm0, %v414_v29 }
  0x73   : > { %1996 = vmatmul.msk.f32.gmra.mxu3 %vm434_vm0, %v1095_v30  ;;  %1980 = vmatmul.msk.f32.gmra.mxu2 %vm434_vm0, %v1095_v30 }
  0x79   : > { %1918 = vmatmul.msk.f32.gmra.mxu0 %vm434_vm0, %v415_v31  ;;  %1950 = vmatmul.msk.f32.gmra.mxu1 %vm434_vm0, %v415_v31  ;;  %v430_v31 = vld [vmem:[%s3313_s1 + $0xe0] sm:$0xff] }
  0x7b   : > { %1997 = vmatmul.msk.f32.gmra.mxu3 %vm434_vm0, %v1096_v32  ;;  %1981 = vmatmul.msk.f32.gmra.mxu2 %vm434_vm0, %v1096_v32 }
  0x81   : > { %1919 = vmatmul.msk.f32.gmra.mxu0 %vm434_vm0, %v416_v33  ;;  %1951 = vmatmul.msk.f32.gmra.mxu1 %vm434_vm0, %v416_v33 }
  0x83   : > { %1982 = vmatmul.msk.f32.gmra.mxu2 %vm434_vm0, %v1097_v34  ;;  %1998 = vmatmul.msk.f32.gmra.mxu3 %vm434_vm0, %v1097_v34 }
  0x89   : > { %1920 = vmatmul.msk.f32.gmra.mxu0 %vm434_vm0, %v417_v35  ;;  %1952 = vmatmul.msk.f32.gmra.mxu1 %vm434_vm0, %v417_v35 }
  0x8b   : > { %1999 = vmatmul.msk.f32.gmra.mxu3 %vm434_vm0, %v1098_v36  ;;  %1983 = vmatmul.msk.f32.gmra.mxu2 %vm434_vm0, %v1098_v36  ;;  %v431_v36 = vld [vmem:[%s3313_s1 + $0xe8] sm:$0xff] }
  0x8e   : > { %v2414_v37 = vpop.f32.mrf.mxu0  ;;  %v2416_v38 = vpop.f32.mrf.mxu1 }
  0x91   : > { %1921 = vmatmul.msk.f32.gmra.mxu0 %vm434_vm0, %v418_v39  ;;  %1953 = vmatmul.msk.f32.gmra.mxu1 %vm434_vm0, %v418_v39 }
  0x93   : > { %2000 = vmatmul.msk.f32.gmra.mxu3 %vm434_vm0, %v1099_v40  ;;  %1984 = vmatmul.msk.f32.gmra.mxu2 %vm434_vm0, %v1099_v40 }
  0x96   : > { %v551_v41 = vpop.f32.mrf.mxu0  ;;  %v2428_v42 = vpop.f32.mrf.mxu2 }
  0x97   : > { %v664_v44 = vpop.f32.mrf.mxu1  ;;  %v2433_v45 = vpop.f32.mrf.mxu3  ;;  %765 = vrot.lane.b32.xlu0 %v551_v41, %s2128_s26 }
  0x98   : > { %767 = vrot.lane.b32.xlu1 %v664_v44, %s2128_s26 }
  0x99   : > { %1922 = vmatmul.msk.f32.gmra.mxu0 %vm434_vm0, %v419_v43  ;;  %1954 = vmatmul.msk.f32.gmra.mxu1 %vm434_vm0, %v419_v43 }
  0x9e   : > { %v554_v46 = vpop.f32.mrf.mxu0  ;;  %v2439_v47 = vpop.f32.mrf.mxu2 }
  0x9f   : > { %v667_v49 = vpop.f32.mrf.mxu1  ;;  %v2444_v50 = vpop.f32.mrf.mxu3 }
  0xa0   : > { %778 = vrot.lane.b32.xlu2 %v667_v49, %s2129_s29  ;;  %776 = vrot.lane.b32.xlu1 %v554_v46, %s2129_s29  ;;  %v432_v46 = vld [vmem:[%s3313_s1 + $0xf0] sm:$0xff]  ;;  %v769_v49 = vlaneseq }
  0xa1   : > { %1923 = vmatmul.msk.f32.gmra.mxu0 %vm434_vm0, %v420_v48  ;;  %1955 = vmatmul.msk.f32.gmra.mxu1 %vm434_vm0, %v420_v48 }
  0xa6   : > { %v557_v51 = vpop.f32.mrf.mxu0  ;;  %v1168_v52 = vpop.f32.mrf.mxu2 }
  0xa7   : > { %v670_v54 = vpop.f32.mrf.mxu1  ;;  %v1233_v55 = vpop.f32.mrf.mxu3 }
  0xa8   : > { %1288 = vrot.lane.b32.xlu2 %v1233_v55, %s2128_s26  ;;  %787 = vrot.lane.b32.xlu0 %v670_v54, %s2130_s15  ;;  %v2546_v55 = vand.u32 127, %v769_v49 }
  0xa9   : > { %1286 = vrot.lane.b32.xlu1 %v1168_v52, %s2128_s26  ;;  %1924 = vmatmul.msk.f32.gmra.mxu0 %vm434_vm0, %v421_v53  ;;  %v1282_v52 = vpop.permute.xlu1 %1281 }
  0xaa   : > { %1956 = vmatmul.msk.f32.gmra.mxu1 %vm434_vm0, %v421_v53  ;;  %vm771_vm1 = vcmp.lt.s32.totalorder %v2546_v55, 127  ;;  %vm780_vm2 = vcmp.lt.s32.totalorder %v2546_v55, 126  ;;  %vm789_vm3 = vcmp.lt.s32.totalorder %v2546_v55, 125  ;;  %vm798_vm4 = vcmp.lt.s32.totalorder %v2546_v55, 124 }
  0xab   : > { %vm807_vm5 = vcmp.lt.s32.totalorder %v2546_v55, 123  ;;  %vm816_vm6 = vcmp.lt.s32.totalorder %v2546_v55, 122  ;;  %vm825_vm7 = vcmp.lt.s32.totalorder %v2546_v55, 121  ;;  %vm834_vm8 = vcmp.lt.s32.totalorder %v2546_v55, 120 }
  0xac   : > { %vm843_vm9 = vcmp.lt.s32.totalorder %v2546_v55, 119  ;;  %vm852_vm10 = vcmp.lt.s32.totalorder %v2546_v55, 118  ;;  %vm861_vm11 = vcmp.lt.s32.totalorder %v2546_v55, 117  ;;  %vm870_vm12 = vcmp.lt.s32.totalorder %v2546_v55, 116 }
  0xad   : > { %vm879_vm13 = vcmp.lt.s32.totalorder %v2546_v55, 115  ;;  %vm888_vm14 = vcmp.lt.s32.totalorder %v2546_v55, 114  ;;  %vm897_vm15 = vcmp.lt.s32.totalorder %v2546_v55, 113 }
  0xae   : > { %v560_v56 = vpop.f32.mrf.mxu0  ;;  %v1171_v57 = vpop.f32.mrf.mxu2 }
  0xaf   : > { %v673_v59 = vpop.f32.mrf.mxu1  ;;  %v1236_v60 = vpop.f32.mrf.mxu3 }
  0xb0   : > { %1296 = vrot.lane.b32.xlu0 %v1236_v60, %s2129_s29  ;;  %785 = vrot.lane.b32.xlu2 %v557_v51, %s2130_s15  ;;  %v761_v51 = vpop.permute.xlu0 %760 }
  0xb1   : > { %794 = vrot.lane.b32.xlu1 %v560_v56, %s3331_s18  ;;  %1925 = vmatmul.msk.f32.gmra.mxu0 %vm434_vm0, %v422_v58 }
  0xb2   : > { %1957 = vmatmul.msk.f32.gmra.mxu1 %vm434_vm0, %v422_v58 }
  0xb6   : > { %v563_v61 = vpop.f32.mrf.mxu0  ;;  %v1174_v62 = vpop.f32.mrf.mxu2 }
  0xb7   : > { %v676_v0 = vpop.f32.mrf.mxu1  ;;  %v1239_v1 = vpop.f32.mrf.mxu3 }
  0xb8   : > { %1302 = vrot.lane.b32.xlu0 %v1174_v62, %s2130_s15  ;;  %1294 = vrot.lane.b32.xlu2 %v1171_v57, %s2129_s29 }
  0xb9   : > { %1304 = vrot.lane.b32.xlu1 %v1239_v1, %s2130_s15  ;;  %1926 = vmatmul.msk.f32.gmra.mxu0 %vm434_vm0, %v423_v63 }
  0xba   : > { %1958 = vmatmul.msk.f32.gmra.mxu1 %vm434_vm0, %v423_v63 }
  0xbe   : > { %v566_v2 = vpop.f32.mrf.mxu0  ;;  %v1177_v6 = vpop.f32.mrf.mxu2 }
  0xbf   : > { %v679_v4 = vpop.f32.mrf.mxu1  ;;  %v1242_v5 = vpop.f32.mrf.mxu3 }
  0xc0   : > { %796 = vrot.lane.b32.xlu2 %v673_v59, %s3331_s18  ;;  %803 = vrot.lane.b32.xlu0 %v563_v61, %s3329_s25 }
  0xc1   : > { %805 = vrot.lane.b32.xlu1 %v676_v0, %s3329_s25  ;;  %1927 = vmatmul.msk.f32.gmra.mxu0 %vm434_vm0, %v424_v3 }
  0xc2   : > { %1959 = vmatmul.msk.f32.gmra.mxu1 %vm434_vm0, %v424_v3  ;;  %v763_v3 = vadd.f32 %v761_v51, %v2414_v37 }
  0xc6   : > { %v569_v7 = vpop.f32.mrf.mxu0  ;;  %v1180_v11 = vpop.f32.mrf.mxu2 }
  0xc7   : > { %v682_v9 = vpop.f32.mrf.mxu1  ;;  %v1245_v10 = vpop.f32.mrf.mxu3 }
  0xc8   : > { %1312 = vrot.lane.b32.xlu2 %v1242_v5, %s3331_s18  ;;  %814 = vrot.lane.b32.xlu0 %v679_v4, %s3327_s30  ;;  %v764_v4 = vadd.f32 %v761_v51, %v2416_v38 }
  0xc9   : > { %1310 = vrot.lane.b32.xlu1 %v1177_v6, %s3331_s18  ;;  %1928 = vmatmul.msk.f32.gmra.mxu0 %vm434_vm0, %v425_v8  ;;  %s2158_s18 = smov 97  }
  0xca   : > { %1960 = vmatmul.msk.f32.gmra.mxu1 %vm434_vm0, %v425_v8 }
  0xce   : > { %v572_v12 = vpop.f32.mrf.mxu0  ;;  %v1183_v16 = vpop.f32.mrf.mxu2 }
  0xcf   : > { %v685_v14 = vpop.f32.mrf.mxu1  ;;  %v1248_v15 = vpop.f32.mrf.mxu3 }
  0xd0   : > { %1320 = vrot.lane.b32.xlu0 %v1245_v10, %s3329_s25  ;;  %812 = vrot.lane.b32.xlu2 %v566_v2, %s3327_s30 }
  0xd1   : > { %821 = vrot.lane.b32.xlu1 %v569_v7, %s3325_s17  ;;  %1929 = vmatmul.msk.f32.gmra.mxu0 %vm434_vm0, %v426_v13 }
  0xd2   : > { %1961 = vmatmul.msk.f32.gmra.mxu1 %vm434_vm0, %v426_v13 }
  0xd6   : > { %v575_v17 = vpop.f32.mrf.mxu0  ;;  %v1186_v24 = vpop.f32.mrf.mxu2 }
  0xd7   : > { %v688_v19 = vpop.f32.mrf.mxu1  ;;  %v1251_v20 = vpop.f32.mrf.mxu3 }
  0xd8   : > { %1326 = vrot.lane.b32.xlu0 %v1183_v16, %s3327_s30  ;;  %1318 = vrot.lane.b32.xlu2 %v1180_v11, %s3329_s25  ;;  %s3333_s25 = smov 124  }
  0xd9   : > { %1328 = vrot.lane.b32.xlu1 %v1248_v15, %s3327_s30  ;;  %1930 = vmatmul.msk.f32.gmra.mxu0 %vm434_vm0, %v427_v18 }
  0xda   : > { %1962 = vmatmul.msk.f32.gmra.mxu1 %vm434_vm0, %v427_v18 }
  0xde   : > { %v578_v21 = vpop.f32.mrf.mxu0  ;;  %v1189_v29 = vpop.f32.mrf.mxu2 }
  0xdf   : > { %v691_v23 = vpop.f32.mrf.mxu1  ;;  %v1254_v27 = vpop.f32.mrf.mxu3 }
  0xe0   : > { %823 = vrot.lane.b32.xlu2 %v682_v9, %s3325_s17  ;;  %830 = vrot.lane.b32.xlu0 %v572_v12, %s2135_s27 }
  0xe1   : > { %832 = vrot.lane.b32.xlu1 %v685_v14, %s2135_s27  ;;  %1931 = vmatmul.msk.f32.gmra.mxu0 %vm434_vm0, %v428_v22 }
  0xe2   : > { %1963 = vmatmul.msk.f32.gmra.mxu1 %vm434_vm0, %v428_v22 }
  0xe6   : > { %v581_v25 = vpop.f32.mrf.mxu0  ;;  %v1192_v34 = vpop.f32.mrf.mxu2 }
  0xe7   : > { %v694_v28 = vpop.f32.mrf.mxu1  ;;  %v1257_v33 = vpop.f32.mrf.mxu3 }
  0xe8   : > { %1336 = vrot.lane.b32.xlu2 %v1251_v20, %s3325_s17  ;;  %841 = vrot.lane.b32.xlu0 %v688_v19, %s2136_s16 }
  0xe9   : > { %1334 = vrot.lane.b32.xlu1 %v1186_v24, %s3325_s17  ;;  %1932 = vmatmul.msk.f32.gmra.mxu0 %vm434_vm0, %v429_v26 }
  0xea   : > { %1964 = vmatmul.msk.f32.gmra.mxu1 %vm434_vm0, %v429_v26 }
  0xee   : > { %v584_v30 = vpop.f32.mrf.mxu0  ;;  %v1195_v48 = vpop.f32.mrf.mxu2 }
  0xef   : > { %v697_v32 = vpop.f32.mrf.mxu1  ;;  %v1260_v41 = vpop.f32.mrf.mxu3 }
  0xf0   : > { %1344 = vrot.lane.b32.xlu0 %v1254_v27, %s2135_s27  ;;  %839 = vrot.lane.b32.xlu2 %v575_v17, %s2136_s16  ;;  %v1284_v27 = vadd.f32 %v1282_v52, %v2439_v47 }
  0xf1   : > { %848 = vrot.lane.b32.xlu1 %v578_v21, %s2137_s23  ;;  %1933 = vmatmul.msk.f32.gmra.mxu0 %vm434_vm0, %v430_v31 }
  0xf2   : > { %1965 = vmatmul.msk.f32.gmra.mxu1 %vm434_vm0, %v430_v31 }
  0xf6   : > { %v2528_v35 = vpop.f32.mrf.mxu0  ;;  %v1198_v59 = vpop.f32.mrf.mxu2 }
  0xf7   : > { %v700_v39 = vpop.f32.mrf.mxu1  ;;  %v1263_v54 = vpop.f32.mrf.mxu3 }
  0xf8   : > { %1350 = vrot.lane.b32.xlu0 %v1192_v34, %s2136_s16  ;;  %1342 = vrot.lane.b32.xlu2 %v1189_v29, %s2135_s27  ;;  %s2139_s27 = smov 116  }
  0xf9   : > { %1352 = vrot.lane.b32.xlu1 %v1257_v33, %s2136_s16  ;;  %1934 = vmatmul.msk.f32.gmra.mxu0 %vm434_vm0, %v431_v36  ;;  %s2140_s16 = smov 115  }
  0xfa   : > { %v779_v40 = vpop.permute.xlu2 %778  ;;  %1966 = vmatmul.msk.f32.gmra.mxu1 %vm434_vm0, %v431_v36 }
  0xfe   : > { %v2536_v43 = vpop.f32.mrf.mxu0  ;;  %v1201_v11 = vpop.f32.mrf.mxu2 }
  0xff   : > { %v703_v44 = vpop.f32.mrf.mxu1  ;;  %v1266_v1 = vpop.f32.mrf.mxu3 }
 0x100   : > { %850 = vrot.lane.b32.xlu2 %v691_v23, %s2137_s23  ;;  %857 = vrot.lane.b32.xlu0 %v581_v25, %s2138_s20 }
 0x101   : > { %859 = vrot.lane.b32.xlu1 %v694_v28, %s2138_s20  ;;  %1935 = vmatmul.msk.f32.gmra.mxu0 %vm434_vm0, %v432_v46  ;;  %v1285_v28 = vadd.f32 %v1282_v52, %v2444_v50 }
 0x102   : > { %v1289_v53 = vpop.permute.xlu2 %1288  ;;  %1967 = vmatmul.msk.f32.gmra.mxu1 %vm434_vm0, %v432_v46 }
 0x106   : > { %v2548_v56 = vpop.f32.mrf.mxu0  ;;  %v1204_v25 = vpop.f32.mrf.mxu2 }
 0x107   : > { %v2550_v57 = vpop.f32.mrf.mxu1  ;;  %v1269_v14 = vpop.f32.mrf.mxu3 }
 0x108   : > { %1360 = vrot.lane.b32.xlu2 %v1260_v41, %s2137_s23  ;;  %868 = vrot.lane.b32.xlu0 %v697_v32, %s2139_s27 }
 0x109   : > { %1358 = vrot.lane.b32.xlu1 %v1195_v48, %s2137_s23  ;;  %v766_v58 = vpop.permute.xlu0 %765  ;;  %s2141_s23 = smov 114  }
 0x10a   : > { %v768_v60 = vpop.permute.xlu1 %767  ;;  %v786_v61 = vpop.permute.xlu2 %785 }
 0x10b   : > { %v772_v62 = vsel %vm771_vm1, %v766_v58, %v768_v60  ;;  %v773_v63 = vsel %vm771_vm1, %v768_v60, %v766_v58 }
 0x10c   : > { %v774_v5 = vadd.f32 %v772_v62, %v763_v3  ;;  %v775_v6 = vadd.f32 %v773_v63, %v764_v4 }
 0x10e   : > { %v2560_v0 = vpop.f32.mrf.mxu0 }
 0x10f   : > { %v2562_v2 = vpop.f32.mrf.mxu1 }
 0x110   : > { %1368 = vrot.lane.b32.xlu0 %v1263_v54, %s2138_s20  ;;  %866 = vrot.lane.b32.xlu2 %v584_v30, %s2139_s27 }
 0x111   : > { %1376 = vrot.lane.b32.xlu1 %v1266_v1, %s2139_s27  ;;  %v1207_v1 = vpop.f32.mrf.mxu2 }
 0x112   : > { %v777_v7 = vpop.permute.xlu1 %776  ;;  %v1295_v8 = vpop.permute.xlu2 %1294 }
 0x113   : > { %v781_v9 = vsel %vm780_vm2, %v777_v7, %v779_v40  ;;  %v782_v37 = vsel %vm780_vm2, %v779_v40, %v777_v7  ;;  %v1272_v40 = vpop.f32.mrf.mxu3 }
 0x114   : > { %v783_v10 = vadd.f32 %v781_v9, %v774_v5  ;;  %v784_v38 = vadd.f32 %v782_v37, %v775_v6 }
 0x116   : > { %v2574_v12 = vpop.f32.mrf.mxu0 }
 0x117   : > { %v2576_v13 = vpop.f32.mrf.mxu1 }
 0x118   : > { %877 = vrot.lane.b32.xlu0 %v700_v39, %s2140_s16  ;;  %1366 = vrot.lane.b32.xlu2 %v1198_v59, %s2138_s20  ;;  %s2146_s20 = smov 108  }
 0x119   : > { %886 = vrot.lane.b32.xlu1 %v703_v44, %s2141_s23 }
 0x11a   : > { %v788_v15 = vpop.permute.xlu0 %787  ;;  %v797_v16 = vpop.permute.xlu2 %796 }
 0x11b   : > { %v790_v17 = vsel %vm789_vm3, %v786_v61, %v788_v15  ;;  %v791_v18 = vsel %vm789_vm3, %v788_v15, %v786_v61  ;;  %v1287_v19 = vpop.permute.xlu1 %1286  ;;  %v1275_v61 = vpop.f32.mrf.mxu3 }
 0x11c   : > { %v792_v20 = vadd.f32 %v790_v17, %v783_v10  ;;  %v793_v21 = vadd.f32 %v791_v18, %v784_v38  ;;  %v1290_v22 = vsel %vm771_vm1, %v1287_v19, %v1289_v53  ;;  %v1291_v23 = vsel %vm771_vm1, %v1289_v53, %v1287_v19 }
 0x11d   : > { %v1292_v29 = vadd.f32 %v1290_v22, %v1284_v27  ;;  %v1293_v30 = vadd.f32 %v1291_v23, %v1285_v28 }
 0x11e   : > { %v2590_v24 = vpop.f32.mrf.mxu0 }
 0x11f   : > { %v2592_v26 = vpop.f32.mrf.mxu1 }
 0x120   : > { %1374 = vrot.lane.b32.xlu0 %v1201_v11, %s2139_s27  ;;  %875 = vrot.lane.b32.xlu2 %v2528_v35, %s2140_s16  ;;  %s2147_s27 = smov 109  }
 0x121   : > { %1382 = vrot.lane.b32.xlu1 %v1204_v25, %s2140_s16 }
 0x122   : > { %v1297_v31 = vpop.permute.xlu0 %1296  ;;  %v1313_v32 = vpop.permute.xlu2 %1312 }
 0x123   : > { %v1298_v33 = vsel %vm780_vm2, %v1295_v8, %v1297_v31  ;;  %v1299_v47 = vsel %vm780_vm2, %v1297_v31, %v1295_v8  ;;  %v795_v50 = vpop.permute.xlu1 %794 }
 0x124   : > { %v1300_v34 = vadd.f32 %v1298_v33, %v1292_v29  ;;  %v1301_v36 = vadd.f32 %v1299_v47, %v1293_v30  ;;  %v799_v35 = vsel %vm798_vm4, %v795_v50, %v797_v16  ;;  %v800_v39 = vsel %vm798_vm4, %v797_v16, %v795_v50 }
 0x125   : > { %v801_v41 = vadd.f32 %v799_v35, %v792_v20  ;;  %v802_v44 = vadd.f32 %v800_v39, %v793_v21 }
 0x126   : > { %v2609_v46 = vpop.f32.mrf.mxu0 }
 0x127   : > { %v2611_v48 = vpop.f32.mrf.mxu1 }
 0x128   : > { %1384 = vrot.lane.b32.xlu2 %v1269_v14, %s2140_s16  ;;  %884 = vrot.lane.b32.xlu0 %v2536_v43, %s2141_s23  ;;  %s2148_s16 = smov 107  }
 0x129   : > { %893 = vrot.lane.b32.xlu1 %v2548_v56, %s2142_s24 }
 0x12a   : > { %v1303_v49 = vpop.permute.xlu0 %1302  ;;  %v813_v51 = vpop.permute.xlu2 %812 }
 0x12b   : > { %v1305_v52 = vpop.permute.xlu1 %1304 }
 0x12c   : > { %v1306_v53 = vsel %vm789_vm3, %v1303_v49, %v1305_v52  ;;  %v1307_v54 = vsel %vm789_vm3, %v1305_v52, %v1303_v49 }
 0x12d   : > { %v1308_v58 = vadd.f32 %v1306_v53, %v1300_v34  ;;  %v1309_v59 = vadd.f32 %v1307_v54, %v1301_v36 }
 0x12e   : > { %v2622_v60 = vpop.f32.mrf.mxu0 }
 0x12f   : > { %v721_v62 = vpop.f32.mrf.mxu1 }
 0x130   : > { %895 = vrot.lane.b32.xlu2 %v2550_v57, %s2142_s24  ;;  %1392 = vrot.lane.b32.xlu0 %v1272_v40, %s2141_s23 }
 0x131   : > { %1400 = vrot.lane.b32.xlu1 %v1275_v61, %s2142_s24 }
 0x132   : > { %v804_v43 = vpop.permute.xlu0 %803  ;;  %v1319_v56 = vpop.permute.xlu2 %1318 }
 0x133   : > { %v806_v63 = vpop.permute.xlu1 %805 }
 0x134   : > { %v808_v3 = vsel %vm807_vm5, %v804_v43, %v806_v63  ;;  %v809_v4 = vsel %vm807_vm5, %v806_v63, %v804_v43 }
 0x135   : > { %v810_v5 = vadd.f32 %v808_v3, %v801_v41  ;;  %v811_v6 = vadd.f32 %v809_v4, %v802_v44 }
 0x136   : > { %v611_v7 = vpop.f32.mrf.mxu0 }
 0x137   : > { %v2633_v57 = vpop.f32.mrf.mxu1 }
 0x138   : > { %1390 = vrot.lane.b32.xlu2 %v1207_v1, %s2141_s23  ;;  %904 = vrot.lane.b32.xlu0 %v2562_v2, %s2143_s28  ;;  %s2149_s23 = smov 105  }
 0x139   : > { %913 = vrot.lane.b32.xlu1 %v2576_v13, %s2144_s14  ;;  %v1210_v13 = vpop.f32.mrf.mxu2 }
 0x13a   : > { %v815_v8 = vpop.permute.xlu0 %814  ;;  %v824_v9 = vpop.permute.xlu2 %823 }
 0x13b   : > { %v1311_v37 = vpop.permute.xlu1 %1310  ;;  %v817_v10 = vsel %vm816_vm6, %v813_v51, %v815_v8  ;;  %v818_v38 = vsel %vm816_vm6, %v815_v8, %v813_v51 }
 0x13c   : > { %v1314_v11 = vsel %vm798_vm4, %v1311_v37, %v1313_v32  ;;  %v1315_v2 = vsel %vm798_vm4, %v1313_v32, %v1311_v37  ;;  %v819_v14 = vadd.f32 %v817_v10, %v810_v5  ;;  %v820_v15 = vadd.f32 %v818_v38, %v811_v6  ;;  %v1427_v6 = vld [vmem:[%s3318_s6 + $0x78] sm:$0xff] }
 0x13d   : > { %v1316_v16 = vadd.f32 %v1314_v11, %v1308_v58  ;;  %v1317_v17 = vadd.f32 %v1315_v2, %v1309_v59  ;;  %1444 = vmatpush.msra.mxu2 %v1427_v6 }
 0x13e   : > { %v2648_v18 = vpop.f32.mrf.mxu0 }
 0x13f   : > { %v2650_v19 = vpop.f32.mrf.mxu1 }
 0x140   : > { %1398 = vrot.lane.b32.xlu0 %v1210_v13, %s2142_s24  ;;  %902 = vrot.lane.b32.xlu2 %v2560_v0, %s2143_s28  ;;  %s2150_s24 = smov 106   ;;  %s2151_s28 = smov 104  }
 0x141   : > { %920 = vrot.lane.b32.xlu1 %v2590_v24, %s2145_s19 }
 0x142   : > { %v1321_v20 = vpop.permute.xlu0 %1320  ;;  %v1337_v21 = vpop.permute.xlu2 %1336 }
 0x143   : > { %v1322_v22 = vsel %vm807_vm5, %v1319_v56, %v1321_v20  ;;  %v1323_v23 = vsel %vm807_vm5, %v1321_v20, %v1319_v56  ;;  %v822_v25 = vpop.permute.xlu1 %821 }
 0x144   : > { %v1324_v27 = vadd.f32 %v1322_v22, %v1316_v16  ;;  %v1325_v28 = vadd.f32 %v1323_v23, %v1317_v17  ;;  %v826_v29 = vsel %vm825_vm7, %v822_v25, %v824_v9  ;;  %v827_v0 = vsel %vm825_vm7, %v824_v9, %v822_v25 }
 0x145   : > { %v828_v24 = vadd.f32 %v826_v29, %v819_v14  ;;  %v829_v30 = vadd.f32 %v827_v0, %v820_v15 }
 0x146   : > { %v2664_v31 = vpop.f32.mrf.mxu0 }
 0x147   : > { %v730_v32 = vpop.f32.mrf.mxu1 }
 0x148   : > { %922 = vrot.lane.b32.xlu2 %v2592_v26, %s2145_s19  ;;  %911 = vrot.lane.b32.xlu0 %v2574_v12, %s2144_s14  ;;  %s2154_s19 = smov 101  }
 0x149   : > { %940 = vrot.lane.b32.xlu1 %v721_v62, %s2146_s20 }
 0x14a   : > { %v1327_v33 = vpop.permute.xlu0 %1326  ;;  %v840_v47 = vpop.permute.xlu2 %839 }
 0x14b   : > { %v1329_v50 = vpop.permute.xlu1 %1328 }
 0x14c   : > { %v1330_v34 = vsel %vm816_vm6, %v1327_v33, %v1329_v50  ;;  %v1331_v36 = vsel %vm816_vm6, %v1329_v50, %v1327_v33  ;;  %v1440_v33 = vld [vmem:[%s3318_s6 + $0xe0] sm:$0xff] }
 0x14d   : > { %v1332_v35 = vadd.f32 %v1330_v34, %v1324_v27  ;;  %v1333_v39 = vadd.f32 %v1331_v36, %v1325_v28  ;;  %v1425_v27 = vld [vmem:[%s3318_s6 + $0x68] sm:$0xff] }
 0x14e   : > { %v620_v40 = vpop.f32.mrf.mxu0  ;;  %v1441_v28 = vld [vmem:[%s3318_s6 + $0xe8] sm:$0xff] }
 0x14f   : > { %v733_v41 = vpop.f32.mrf.mxu1 }
 0x150   : > { %931 = vrot.lane.b32.xlu0 %v2611_v48, %s2147_s27  ;;  %929 = vrot.lane.b32.xlu2 %v2609_v46, %s2147_s27 }
 0x151   : > { %947 = vrot.lane.b32.xlu1 %v611_v7, %s2148_s16  ;;  %v1443_v7 = vld [vmem:[%s3318_s6 + $0xf8] sm:$0xff] }
 0x152   : > { %v831_v12 = vpop.permute.xlu0 %830  ;;  %v1343_v26 = vpop.permute.xlu2 %1342  ;;  %1464 = vmatpush.msra.mxu3 %v1443_v7 }
 0x153   : > { %v833_v44 = vpop.permute.xlu1 %832 }
 0x154   : > { %v835_v49 = vsel %vm834_vm8, %v831_v12, %v833_v44  ;;  %v836_v51 = vsel %vm834_vm8, %v833_v44, %v831_v12 }
 0x155   : > { %v837_v52 = vadd.f32 %v835_v49, %v828_v24  ;;  %v838_v53 = vadd.f32 %v836_v51, %v829_v30  ;;  %v1423_v49 = vld [vmem:[%s3318_s6 + $0x58] sm:$0xff] }
 0x156   : > { %v623_v54 = vpop.f32.mrf.mxu0  ;;  %v1439_v51 = vld [vmem:[%s3318_s6 + $0xd8] sm:$0xff] }
 0x157   : > { %v736_v58 = vpop.f32.mrf.mxu1 }
 0x158   : > { %949 = vrot.lane.b32.xlu2 %v2633_v57, %s2148_s16  ;;  %938 = vrot.lane.b32.xlu0 %v2622_v60, %s2146_s20  ;;  %s2152_s16 = smov 102  }
 0x159   : > { %967 = vrot.lane.b32.xlu1 %v730_v32, %s2149_s23  ;;  %v1424_v32 = vld [vmem:[%s3318_s6 + $0x60] sm:$0xff] }
 0x15a   : > { %v842_v46 = vpop.permute.xlu0 %841  ;;  %v851_v48 = vpop.permute.xlu2 %850 }
 0x15b   : > { %v1335_v59 = vpop.permute.xlu1 %1334  ;;  %v844_v61 = vsel %vm843_vm9, %v840_v47, %v842_v46  ;;  %v845_v62 = vsel %vm843_vm9, %v842_v46, %v840_v47  ;;  %v1422_v46 = vld [vmem:[%s3318_s6 + $0x50] sm:$0xff] }
 0x15c   : > { %v1338_v43 = vsel %vm825_vm7, %v1335_v59, %v1337_v21  ;;  %v1339_v60 = vsel %vm825_vm7, %v1337_v21, %v1335_v59  ;;  %v846_v56 = vadd.f32 %v844_v61, %v837_v52  ;;  %v847_v63 = vadd.f32 %v845_v62, %v838_v53  ;;  %v1421_v59 = vld [vmem:[%s3318_s6 + $0x48] sm:$0xff] }
 0x15d   : > { %v1340_v1 = vadd.f32 %v1338_v43, %v1332_v35  ;;  %v1341_v3 = vadd.f32 %v1339_v60, %v1333_v39  ;;  %v1437_v62 = vld [vmem:[%s3318_s6 + $0xc8] sm:$0xff]  ;;  %v1638_v43 = vld [vmem:[%s3320_s8] sm:$0xff] }
 0x15e   : > { %v626_v4 = vpop.f32.mrf.mxu0  ;;  %v1420_v60 = vld [vmem:[%s3318_s6 + $0x40] sm:$0xff] }
 0x15f   : > { %v739_v5 = vpop.f32.mrf.mxu1 }
 0x160   : > { %958 = vrot.lane.b32.xlu0 %v2650_v19, %s2150_s24  ;;  %956 = vrot.lane.b32.xlu2 %v2648_v18, %s2150_s24  ;;  %v1426_v18 = vld [vmem:[%s3318_s6 + $0x70] sm:$0xff]  ;;  %s2155_s24 = smov 99  }
 0x161   : > { %974 = vrot.lane.b32.xlu1 %v620_v40, %s2151_s28  ;;  %v1442_v19 = vld [vmem:[%s3318_s6 + $0xf0] sm:$0xff]  ;;  %1445 = vmatpush.msra.mxu2 %v1426_v18  ;;  %v1431_v18 = vld [vmem:[%s3318_s6 + $0x98] sm:$0xff] }
 0x162   : > { %v1345_v57 = vpop.permute.xlu0 %1344  ;;  %v2701_v8 = vpop.permute.xlu2 %1360  ;;  %1465 = vmatpush.msra.mxu3 %v1442_v19 }
 0x163   : > { %v1346_v9 = vsel %vm834_vm8, %v1343_v26, %v1345_v57  ;;  %v1347_v37 = vsel %vm834_vm8, %v1345_v57, %v1343_v26  ;;  %v849_v10 = vpop.permute.xlu1 %848  ;;  %1446 = vmatpush.msra.mxu2 %v1425_v27  ;;  %v1412_v27 = vld [vmem:[%s3318_s6] sm:$0xff] }
 0x164   : > { %v2707_v38 = vadd.f32 %v1346_v9, %v1340_v1  ;;  %v2709_v11 = vadd.f32 %v1347_v37, %v1341_v3  ;;  %v853_v2 = vsel %vm852_vm10, %v849_v10, %v851_v48  ;;  %v854_v14 = vsel %vm852_vm10, %v851_v48, %v849_v10  ;;  %1466 = vmatpush.msra.mxu3 %v1441_v28  ;;  %v1438_v48 = vld [vmem:[%s3318_s6 + $0xd0] sm:$0xff]  ;;  %v1435_v1 = vld [vmem:[%s3318_s6 + $0xb8] sm:$0xff]  ;;  %v1428_v28 = vld [vmem:[%s3318_s6 + $0x80] sm:$0xff] }
 0x165   : > { %v855_v15 = vadd.f32 %v853_v2, %v846_v56  ;;  %v856_v16 = vadd.f32 %v854_v14, %v847_v63  ;;  %1447 = vmatpush.msra.mxu2 %v1424_v32  ;;  %v1436_v56 = vld [vmem:[%s3318_s6 + $0xc0] sm:$0xff]  ;;  %v1419_v63 = vld [vmem:[%s3318_s6 + $0x38] sm:$0xff]  ;;  %v1418_v37 = vld [vmem:[%s3318_s6 + $0x30] sm:$0xff] }
 0x166   : > { %v629_v17 = vpop.f32.mrf.mxu0  ;;  %1467 = vmatpush.msra.mxu3 %v1440_v33  ;;  %v1434_v10 = vld [vmem:[%s3318_s6 + $0xb0] sm:$0xff]  ;;  %v1417_v2 = vld [vmem:[%s3318_s6 + $0x28] sm:$0xff] }
 0x167   : > { %v742_v13 = vpop.f32.mrf.mxu1  ;;  %1448 = vmatpush.msra.mxu2 %v1423_v49  ;;  %v1433_v14 = vld [vmem:[%s3318_s6 + $0xa8] sm:$0xff] }
 0x168   : > { %976 = vrot.lane.b32.xlu2 %v733_v41, %s2151_s28  ;;  %965 = vrot.lane.b32.xlu0 %v2664_v31, %s2149_s23  ;;  %s2153_s23 = smov 103   ;;  %s2157_s28 = smov 98  }
 0x169   : > { %994 = vrot.lane.b32.xlu1 %v739_v5, %s2152_s16  ;;  %1468 = vmatpush.msra.mxu3 %v1439_v51 }
 0x16a   : > { %v2724_v20 = vpop.permute.xlu0 %1350  ;;  %v867_v21 = vpop.permute.xlu2 %866  ;;  %1449 = vmatpush.msra.mxu2 %v1422_v46 }
 0x16b   : > { %v2726_v22 = vpop.permute.xlu1 %1352  ;;  %1469 = vmatpush.msra.mxu3 %v1438_v48 }
 0x16c   : > { %1450 = vmatpush.msra.mxu2 %v1421_v59 }
 0x16d   : > { %1470 = vmatpush.msra.mxu3 %v1437_v62 }
 0x16e   : > { %v632_v23 = vpop.f32.mrf.mxu0  ;;  %1451 = vmatpush.msra.mxu2 %v1420_v60 }
 0x16f   : > { %v745_v25 = vpop.f32.mrf.mxu1  ;;  %1471 = vmatpush.msra.mxu3 %v1436_v56 }
 0x170   : > { %985 = vrot.lane.b32.xlu0 %v736_v58, %s2153_s23  ;;  %983 = vrot.lane.b32.xlu2 %v623_v54, %s2153_s23  ;;  %s2156_s23 = smov 100  }
 0x171   : > { %1001 = vrot.lane.b32.xlu1 %v629_v17, %s2154_s19  ;;  %1452 = vmatpush.msra.mxu2 %v1419_v63  ;;  %v1415_v17 = vld [vmem:[%s3318_s6 + $0x18] sm:$0xff] }
 0x172   : > { %v858_v29 = vpop.permute.xlu0 %857  ;;  %v2735_v0 = vpop.permute.xlu2 %1366  ;;  %1472 = vmatpush.msra.mxu3 %v1435_v1 }
 0x173   : > { %v860_v24 = vpop.permute.xlu1 %859  ;;  %1453 = vmatpush.msra.mxu2 %v1418_v37 }
 0x174   : > { %v862_v30 = vsel %vm861_vm11, %v858_v29, %v860_v24  ;;  %v863_v31 = vsel %vm861_vm11, %v860_v24, %v858_v29  ;;  %1473 = vmatpush.msra.mxu3 %v1434_v10 }
 0x175   : > { %v864_v47 = vadd.f32 %v862_v30, %v855_v15  ;;  %v865_v50 = vadd.f32 %v863_v31, %v856_v16  ;;  %v1416_v15 = vld [vmem:[%s3318_s6 + $0x20] sm:$0xff]  ;;  %1454 = vmatpush.msra.mxu2 %v1417_v2 }
 0x176   : > { %v635_v34 = vpop.f32.mrf.mxu0  ;;  %v1432_v16 = vld [vmem:[%s3318_s6 + $0xa0] sm:$0xff]  ;;  %1474 = vmatpush.msra.mxu3 %v1433_v14 }
 0x177   : > { %v748_v36 = vpop.f32.mrf.mxu1  ;;  %1455 = vmatpush.msra.mxu2 %v1416_v15 }
 0x178   : > { %1003 = vrot.lane.b32.xlu2 %v742_v13, %s2154_s19  ;;  %992 = vrot.lane.b32.xlu0 %v626_v4, %s2152_s16 }
 0x179   : > { %1019 = vrot.lane.b32.xlu1 %v635_v34, %s2155_s24  ;;  %1475 = vmatpush.msra.mxu3 %v1432_v16 }
 0x17a   : > { %v869_v35 = vpop.permute.xlu0 %868  ;;  %v876_v39 = vpop.permute.xlu2 %875  ;;  %1456 = vmatpush.msra.mxu2 %v1415_v17 }
 0x17b   : > { %v2750_v40 = vpop.permute.xlu1 %1358  ;;  %v871_v41 = vsel %vm870_vm12, %v867_v21, %v869_v35  ;;  %v872_v12 = vsel %vm870_vm12, %v869_v35, %v867_v21  ;;  %v1430_v21 = vld [vmem:[%s3318_s6 + $0x90] sm:$0xff]  ;;  %1476 = vmatpush.msra.mxu3 %v1431_v18 }
 0x17c   : > { %v873_v26 = vadd.f32 %v871_v41, %v864_v47  ;;  %v874_v44 = vadd.f32 %v872_v12, %v865_v50  ;;  %v1354_v41 = vsel %vm843_vm9, %v2724_v20, %v2726_v22  ;;  %v1355_v12 = vsel %vm843_vm9, %v2726_v22, %v2724_v20 }
 0x17d   : > { %1477 = vmatpush.msra.mxu3 %v1430_v21  ;;  %v1363_v49 = vsel %vm852_vm10, %v2701_v8, %v2750_v40  ;;  %v1356_v51 = vadd.f32 %v1354_v41, %v2707_v38  ;;  %v1078_v41 = vld [vmem:[%s3315_s3 + $0xd0] sm:$0xff] }
 0x17e   : > { %v638_v61 = vpop.f32.mrf.mxu0 }
 0x17f   : > { %v751_v52 = vpop.f32.mrf.mxu1 }
 0x180   : > { %1012 = vrot.lane.b32.xlu0 %v745_v25, %s2156_s23  ;;  %1010 = vrot.lane.b32.xlu2 %v632_v23, %s2156_s23  ;;  %v1413_v23 = vld [vmem:[%s3318_s6 + $0x8] sm:$0xff] }
 0x181   : > { %1030 = vrot.lane.b32.xlu1 %v751_v52, %s2157_s28  ;;  %v1429_v25 = vld [vmem:[%s3318_s6 + $0x88] sm:$0xff]  ;;  %v1357_v52 = vadd.f32 %v1355_v12, %v2709_v11 }
 0x182   : > { %v2762_v53 = vpop.permute.xlu0 %1368  ;;  %v2764_v54 = vpop.permute.xlu2 %1384  ;;  %1478 = vmatpush.msra.mxu3 %v1429_v25  ;;  %v1061_v12 = vld [vmem:[%s3315_s3 + $0x48] sm:$0xff] }
 0x183   : > { %v2766_v58 = vpop.permute.xlu1 %1376  ;;  %v1370_v20 = vsel %vm861_vm11, %v2735_v0, %v2762_v53  ;;  %v1371_v22 = vsel %vm861_vm11, %v2762_v53, %v2735_v0  ;;  %v1365_v48 = vadd.f32 %v1363_v49, %v1357_v52  ;;  %v1060_v49 = vld [vmem:[%s3315_s3 + $0x40] sm:$0xff]  ;;  %vm915_vm11 = vcmp.lt.s32.totalorder %v2546_v55, 111  ;;  %v1059_v52 = vld [vmem:[%s3315_s3 + $0x38] sm:$0xff] }
 0x184   : > { %1479 = vmatpush.msra.mxu3 %v1428_v28  ;;  %v1082_v28 = vld [vmem:[%s3315_s3 + $0xf0] sm:$0xff] }
 0x188   : > { %1021 = vrot.lane.b32.xlu2 %v748_v36, %s2155_s24  ;;  %1028 = vrot.lane.b32.xlu0 %v638_v61, %s2157_s28  ;;  %s2017_s24 = sshll.u32 %s2235_s22, 3 }
 0x189   : > { %1641 = vperm.xlu1 %2078, %v1638_v43   ;;  %s1782_s28 = scalar_lea.vmem [#allocation2], %s2017_s24 }
 0x18a   : > { %v878_v3 = vpop.permute.xlu0 %877  ;;  %v896_v4 = vpop.permute.xlu2 %895 }
 0x18b   : > { %v887_v5 = vpop.permute.xlu1 %886  ;;  %v880_v6 = vsel %vm879_vm13, %v876_v39, %v878_v3  ;;  %v881_v7 = vsel %vm879_vm13, %v878_v3, %v876_v39 }
 0x18c   : > { %v882_v57 = vadd.f32 %v880_v6, %v873_v26  ;;  %v883_v9 = vadd.f32 %v881_v7, %v874_v44  ;;  %v1362_v44 = vsel %vm852_vm10, %v2750_v40, %v2701_v8  ;;  %v1373_v40 = vadd.f32 %v1371_v22, %v1365_v48 }
 0x18d   : > { %v1364_v46 = vadd.f32 %v1362_v44, %v1356_v51  ;;  %vm906_vm10 = vcmp.lt.s32.totalorder %v2546_v55, 112  ;;  %v1076_v51 = vld [vmem:[%s3315_s3 + $0xc0] sm:$0xff] }
 0x18f   : > { %v1372_v11 = vadd.f32 %v1370_v20, %v1364_v46  ;;  %v1075_v20 = vld [vmem:[%s3315_s3 + $0xb8] sm:$0xff] }
 0x190   : > { %1037 = vrot.lane.b32.xlu2 %v2428_v42, %s2158_s18  ;;  %1039 = vrot.lane.b32.xlu0 %v2433_v45, %s2158_s18  ;;  %v1414_v45 = vld [vmem:[%s3318_s6 + $0x10] sm:$0xff] }
 0x191   : > { %1457 = vmatpush.msra.mxu2 %v1414_v45  ;;  %v1083_v45 = vld [vmem:[%s3315_s3 + $0xf8] sm:$0xff] }
 0x192   : > { %v1375_v13 = vpop.permute.xlu0 %1374  ;;  %v1391_v42 = vpop.permute.xlu2 %1390  ;;  %1504 = vmatpush.msrb.mxu3 %v1083_v45  ;;  %v1068_v45 = vld [vmem:[%s3315_s3 + $0x80] sm:$0xff] }
 0x193   : > { %v1383_v19 = vpop.permute.xlu1 %1382  ;;  %1458 = vmatpush.msra.mxu2 %v1413_v23  ;;  %v1378_v8 = vsel %vm870_vm12, %v1375_v13, %v2766_v58  ;;  %v1379_v38 = vsel %vm870_vm12, %v2766_v58, %v1375_v13  ;;  %vm924_vm12 = vcmp.lt.s32.totalorder %v2546_v55, 110 }
 0x194   : > { %v1380_v43 = vadd.f32 %v1378_v8, %v1372_v11  ;;  %v1381_v0 = vadd.f32 %v1379_v38, %v1373_v40  ;;  %v1386_v53 = vsel %vm879_vm13, %v1383_v19, %v2764_v54  ;;  %v1387_v60 = vsel %vm879_vm13, %v2764_v54, %v1383_v19  ;;  %1505 = vmatpush.msrb.mxu3 %v1082_v28 }
 0x195   : > { %1459 = vmatpush.msra.mxu2 %v1412_v27  ;;  %v1066_v27 = vld [vmem:[%s3315_s3 + $0x70] sm:$0xff]  ;;  %vm933_vm13 = vcmp.lt.s32.totalorder %v2546_v55, 109 }
 0x196   : > { %v1388_v63 = vadd.f32 %v1386_v53, %v1380_v43  ;;  %v1389_v1 = vadd.f32 %v1387_v60, %v1381_v0  ;;  %v1057_v0 = vld [vmem:[%s3315_s3 + $0x28] sm:$0xff]  ;;  %v1056_v53 = vld [vmem:[%s3315_s3 + $0x20] sm:$0xff] }
 0x197   : > { %v1072_v60 = vld [vmem:[%s3315_s3 + $0xa0] sm:$0xff] }
 0x19a   : > { %v885_v29 = vpop.permute.xlu0 %884  ;;  %v2859_v35 = vpop.permute.xlu2 %902 }
 0x19b   : > { %v889_v24 = vsel %vm888_vm14, %v885_v29, %v887_v5  ;;  %v890_v30 = vsel %vm888_vm14, %v887_v5, %v885_v29  ;;  %v894_v31 = vpop.permute.xlu1 %893  ;;  %v1065_v29 = vld [vmem:[%s3315_s3 + $0x68] sm:$0xff] }
 0x19c   : > { %v891_v32 = vadd.f32 %v889_v24, %v882_v57  ;;  %v892_v33 = vadd.f32 %v890_v30, %v883_v9  ;;  %v898_v47 = vsel %vm897_vm15, %v894_v31, %v896_v4  ;;  %v899_v50 = vsel %vm897_vm15, %v896_v4, %v894_v31  ;;  %v1081_v24 = vld [vmem:[%s3315_s3 + $0xe8] sm:$0xff]  ;;  %v1064_v30 = vld [vmem:[%s3315_s3 + $0x60] sm:$0xff] }
 0x19d   : > { %v1080_v31 = vld [vmem:[%s3315_s3 + $0xe0] sm:$0xff]  ;;  %1506 = vmatpush.msrb.mxu3 %v1081_v24 }
 0x19e   : > { %v2855_v34 = vadd.f32 %v898_v47, %v891_v32  ;;  %v2857_v36 = vadd.f32 %v899_v50, %v892_v33  ;;  %v1063_v33 = vld [vmem:[%s3315_s3 + $0x58] sm:$0xff] }
 0x19f   : > { %v1079_v47 = vld [vmem:[%s3315_s3 + $0xd8] sm:$0xff]  ;;  %1507 = vmatpush.msrb.mxu3 %v1080_v31 }
 0x1a1   : > { %1508 = vmatpush.msrb.mxu3 %v1079_v47  ;;  %v2079_v47 = vld [vmem:[%s2250_s13] sm:$0xff] }
 0x1a2   : > { %v1393_v39 = vpop.permute.xlu0 %1392  ;;  %v2887_v59 = vpop.permute.xlu2 %922 }
 0x1a3   : > { %v1401_v26 = vpop.permute.xlu1 %1400  ;;  %v1394_v56 = vsel %vm888_vm14, %v1391_v42, %v1393_v39  ;;  %v1395_v58 = vsel %vm888_vm14, %v1393_v39, %v1391_v42  ;;  %v1067_v42 = vld [vmem:[%s3315_s3 + $0x78] sm:$0xff]  ;;  %v1062_v39 = vld [vmem:[%s3315_s3 + $0x50] sm:$0xff]  ;;  %1509 = vmatpush.msrb.mxu3 %v1078_v41  ;;  %vm942_vm14 = vcmp.lt.s32.totalorder %v2546_v55, 108 }
 0x1a4   : > { %v1396_v3 = vadd.f32 %v1394_v56, %v1388_v63  ;;  %v1397_v4 = vadd.f32 %v1395_v58, %v1389_v1  ;;  %1484 = vmatpush.msrb.mxu2 %v1067_v42  ;;  %v1055_v63 = vld [vmem:[%s3315_s3 + $0x18] sm:$0xff]  ;;  %v1052_v42 = vld [vmem:[%s3315_s3] sm:$0xff] }
 0x1a5   : > { %v1071_v1 = vld [vmem:[%s3315_s3 + $0x98] sm:$0xff] }
 0x1a6   : > { %1485 = vmatpush.msrb.mxu2 %v1066_v27 }
 0x1a8   : > { %1486 = vmatpush.msrb.mxu2 %v1065_v29 }
 0x1aa   : > { %v2895_v61 = vpop.permute.xlu0 %904  ;;  %v2909_v5 = vpop.permute.xlu2 %929  ;;  %1487 = vmatpush.msrb.mxu2 %v1064_v30 }
 0x1ab   : > { %v2897_v62 = vpop.permute.xlu1 %913  ;;  %v907_v22 = vsel %vm906_vm10, %v2859_v35, %v2895_v61  ;;  %v908_v46 = vsel %vm906_vm10, %v2895_v61, %v2859_v35  ;;  %v1058_v35 = vld [vmem:[%s3315_s3 + $0x30] sm:$0xff]  ;;  %vm978_vm10 = vcmp.lt.s32.totalorder %v2546_v55, 104 }
 0x1ac   : > { %1488 = vmatpush.msrb.mxu2 %v1063_v33  ;;  %v909_v40 = vadd.f32 %v907_v22, %v2855_v34  ;;  %v910_v43 = vadd.f32 %v908_v46, %v2857_v36  ;;  %v1074_v61 = vld [vmem:[%s3315_s3 + $0xb0] sm:$0xff]  ;;  %v1073_v34 = vld [vmem:[%s3315_s3 + $0xa8] sm:$0xff] }
 0x1ae   : > { %1489 = vmatpush.msrb.mxu2 %v1062_v39  ;;  %v2080_v39 = vld [vmem:[%s2250_s13 + $0x8] sm:$0xff] }
 0x1b0   : > { %1490 = vmatpush.msrb.mxu2 %v1061_v12 }
 0x1b2   : > { %v1399_v6 = vpop.permute.xlu0 %1398  ;;  %v2919_v13 = vpop.permute.xlu2 %949  ;;  %1491 = vmatpush.msrb.mxu2 %v1060_v49 }
 0x1b3   : > { %v1402_v7 = vsel %vm897_vm15, %v1399_v6, %v1401_v26  ;;  %v1403_v57 = vsel %vm897_vm15, %v1401_v26, %v1399_v6  ;;  %v2915_v54 = vpop.permute.xlu1 %920  ;;  %v1077_v26 = vld [vmem:[%s3315_s3 + $0xc8] sm:$0xff]  ;;  %vm951_vm15 = vcmp.lt.s32.totalorder %v2546_v55, 107 }
 0x1b4   : > { %v1404_v9 = vadd.f32 %v1402_v7, %v1396_v3  ;;  %v1405_v37 = vadd.f32 %v1403_v57, %v1397_v4  ;;  %1510 = vmatpush.msrb.mxu3 %v1077_v26  ;;  %1492 = vmatpush.msrb.mxu2 %v1059_v52  ;;  %v925_v56 = vsel %vm924_vm12, %v2915_v54, %v2887_v59 }
 0x1b5   : > { %v926_v3 = vsel %vm924_vm12, %v2887_v59, %v2915_v54  ;;  %vm996_vm12 = vcmp.lt.s32.totalorder %v2546_v55, 102 }
 0x1b6   : > { %v1408_v10 = vmul.f32 0.01, %v1404_v9  ;;  %v1409_v2 = vmul.f32 0.01, %v1405_v37  ;;  %vm1406_vm8 = vcmp.gt.f32.partialorder %v1404_v9, 0.0  ;;  %vm1407_vm9 = vcmp.gt.f32.partialorder %v1405_v37, 0.0  ;;  %1511 = vmatpush.msrb.mxu3 %v1076_v51  ;;  %1493 = vmatpush.msrb.mxu2 %v1058_v35 }
 0x1b8   : > { %v1410_v14 = vsel %vm1406_vm8, %v1404_v9, %v1408_v10  ;;  %v1411_v15 = vsel %vm1407_vm9, %v1405_v37, %v1409_v2  ;;  %1512 = vmatpush.msrb.mxu3 %v1075_v20  ;;  %1494 = vmatpush.msrb.mxu2 %v1057_v0  ;;  %vm960_vm8 = vcmp.lt.s32.totalorder %v2546_v55, 106  ;;  %vm969_vm9 = vcmp.lt.s32.totalorder %v2546_v55, 105 }
 0x1b9   : > { %1460 = vmatmul.f32.vlgmr.msra.gmra.mxu2 %v1410_v14  ;;  %1480 = vmatmul.f32.vlgmr.msra.gmra.mxu3 %v1411_v15  ;;  %v1070_v14 = vld [vmem:[%s3315_s3 + $0x90] sm:$0xff] }
 0x1ba   : > { %v912_v16 = vpop.permute.xlu0 %911  ;;  %v2931_v21 = vpop.permute.xlu2 %956  ;;  %1513 = vmatpush.msrb.mxu3 %v1074_v61  ;;  %1495 = vmatpush.msrb.mxu2 %v1056_v53 }
 0x1bb   : > { %v2917_v17 = vpop.permute.xlu1 %940  ;;  %v916_v38 = vsel %vm915_vm11, %v912_v16, %v2897_v62  ;;  %v917_v11 = vsel %vm915_vm11, %v2897_v62, %v912_v16  ;;  %vm987_vm11 = vcmp.lt.s32.totalorder %v2546_v55, 103 }
 0x1bc   : > { %v918_v36 = vadd.f32 %v916_v38, %v909_v40  ;;  %v919_v62 = vadd.f32 %v917_v11, %v910_v43  ;;  %1514 = vmatpush.msrb.mxu3 %v1073_v34  ;;  %1496 = vmatpush.msrb.mxu2 %v1055_v63 }
 0x1be   : > { %1515 = vmatpush.msrb.mxu3 %v1072_v60  ;;  %v927_v7 = vadd.f32 %v925_v56, %v918_v36  ;;  %v928_v57 = vadd.f32 %v926_v3, %v919_v62 }
 0x1c0   : > { %1516 = vmatpush.msrb.mxu3 %v1071_v1 }
 0x1c2   : > { %v2921_v18 = vpop.permute.xlu0 %931  ;;  %v2955_v32 = vpop.permute.xlu2 %976  ;;  %1517 = vmatpush.msrb.mxu3 %v1070_v14 }
 0x1c3   : > { %v2923_v19 = vpop.permute.xlu1 %947  ;;  %v934_v4 = vsel %vm933_vm13, %v2909_v5, %v2921_v18  ;;  %v935_v6 = vsel %vm933_vm13, %v2921_v18, %v2909_v5  ;;  %v1054_v5 = vld [vmem:[%s3315_s3 + $0x10] sm:$0xff]  ;;  %v1069_v18 = vld [vmem:[%s3315_s3 + $0x88] sm:$0xff]  ;;  %vm1005_vm13 = vcmp.lt.s32.totalorder %v2546_v55, 101 }
 0x1c4   : > { %v936_v59 = vadd.f32 %v934_v4, %v927_v7  ;;  %v937_v54 = vadd.f32 %v935_v6, %v928_v57  ;;  %1497 = vmatpush.msrb.mxu2 %v1054_v5  ;;  %1518 = vmatpush.msrb.mxu3 %v1069_v18  ;;  %v953_v27 = vsel %vm951_vm15, %v2919_v13, %v2923_v19  ;;  %v1524_v18 = vld [vmem:[%s3319_s7] sm:$0xff] }
 0x1c6   : > { %1519 = vmatpush.msrb.mxu3 %v1068_v45  ;;  %v1526_v45 = vld [vmem:[%s3319_s7 + $0x10] sm:$0xff] }
 0x1c8   : > { %1612 = vmatpush.msra.mxu3 %v2080_v39 }
 0x1ca   : > { %v2933_v23 = vpop.permute.xlu0 %938  ;;  %v2997_v48 = vpop.permute.xlu2 %983 }
 0x1cb   : > { %v2935_v25 = vpop.permute.xlu1 %967  ;;  %v943_v37 = vsel %vm942_vm14, %v2933_v23, %v2917_v17  ;;  %v944_v10 = vsel %vm942_vm14, %v2917_v17, %v2933_v23  ;;  %v1053_v17 = vld [vmem:[%s3315_s3 + $0x8] sm:$0xff]  ;;  %v952_v23 = vsel %vm951_vm15, %v2923_v19, %v2919_v13  ;;  %vm1014_vm14 = vcmp.lt.s32.totalorder %v2546_v55, 100 }
 0x1cc   : > { %v945_v15 = vadd.f32 %v943_v37, %v936_v59  ;;  %v946_v16 = vadd.f32 %v944_v10, %v937_v54  ;;  %1498 = vmatpush.msrb.mxu2 %v1053_v17  ;;  %vm1023_vm15 = vcmp.lt.s32.totalorder %v2546_v55, 99 }
 0x1ce   : > { %1499 = vmatpush.msrb.mxu2 %v1052_v42  ;;  %v954_v24 = vadd.f32 %v952_v23, %v945_v15  ;;  %v955_v30 = vadd.f32 %v953_v27, %v946_v16  ;;  %v1525_v42 = vld [vmem:[%s3319_s7 + $0x8] sm:$0xff]  ;;  %v1527_v23 = vld [vmem:[%s3319_s7 + $0x18] sm:$0xff]  ;;  %v1528_v27 = vld [vmem:[%s3319_s7 + $0x20] sm:$0xff] }
 0x1d0   : > { %1571 = vmatpush.msra.mxu2 %v2079_v47 }
 0x1d2   : > { %v2963_v50 = vpop.permute.xlu0 %958  ;;  %v1004_v2 = vpop.permute.xlu2 %1003 }
 0x1d3   : > { %v2978_v44 = vpop.permute.xlu1 %974  ;;  %v961_v28 = vsel %vm960_vm8, %v2931_v21, %v2963_v50  ;;  %v962_v29 = vsel %vm960_vm8, %v2963_v50, %v2931_v21  ;;  %vm1032_vm8 = vcmp.lt.s32.totalorder %v2546_v55, 98 }
 0x1d4   : > { %v963_v19 = vadd.f32 %v961_v28, %v954_v24  ;;  %v964_v12 = vadd.f32 %v962_v29, %v955_v30  ;;  %v979_v49 = vsel %vm978_vm10, %v2978_v44, %v2955_v32  ;;  %v980_v51 = vsel %vm978_vm10, %v2955_v32, %v2978_v44  ;;  %v1529_v28 = vld [vmem:[%s3319_s7 + $0x28] sm:$0xff]  ;;  %v1530_v29 = vld [vmem:[%s3319_s7 + $0x30] sm:$0xff]  ;;  %v1531_v24 = vld [vmem:[%s3319_s7 + $0x38] sm:$0xff] }
 0x1da   : > { %v2999_v8 = vpop.permute.xlu0 %965  ;;  %v1011_v26 = vpop.permute.xlu2 %1010 }
 0x1db   : > { %v3030_v58 = vpop.permute.xlu1 %994  ;;  %v970_v41 = vsel %vm969_vm9, %v2999_v8, %v2935_v25  ;;  %v971_v13 = vsel %vm969_vm9, %v2935_v25, %v2999_v8  ;;  %vm1041_vm9 = vcmp.lt.s32.totalorder %v2546_v55, 97 }
 0x1dc   : > { %v972_v21 = vadd.f32 %v970_v41, %v963_v19  ;;  %v973_v50 = vadd.f32 %v971_v13, %v964_v12 }
 0x1de   : > { %v981_v20 = vadd.f32 %v979_v49, %v972_v21  ;;  %v982_v22 = vadd.f32 %v980_v51, %v973_v50 }
 0x1e2   : > { %v986_v9 = vpop.permute.xlu0 %985  ;;  %v1022_v32 = vpop.permute.xlu2 %1021 }
 0x1e3   : > { %v1002_v31 = vpop.permute.xlu1 %1001  ;;  %v988_v52 = vsel %vm987_vm11, %v2997_v48, %v986_v9  ;;  %v989_v25 = vsel %vm987_vm11, %v986_v9, %v2997_v48 }
 0x1e4   : > { %v990_v11 = vadd.f32 %v988_v52, %v981_v20  ;;  %v991_v40 = vadd.f32 %v989_v25, %v982_v22  ;;  %v1006_v44 = vsel %vm1005_vm13, %v1002_v31, %v1004_v2  ;;  %v1007_v0 = vsel %vm1005_vm13, %v1004_v2, %v1002_v31 }
 0x1ea   : > { %v993_v33 = vpop.permute.xlu0 %992  ;;  %v1038_v57 = vpop.permute.xlu2 %1037 }
 0x1eb   : > { %v997_v8 = vsel %vm996_vm12, %v993_v33, %v3030_v58  ;;  %v998_v38 = vsel %vm996_vm12, %v3030_v58, %v993_v33  ;;  %v1020_v43 = vpop.permute.xlu1 %1019 }
 0x1ec   : > { %v999_v35 = vadd.f32 %v997_v8, %v990_v11  ;;  %v1000_v61 = vadd.f32 %v998_v38, %v991_v40  ;;  %v1024_v63 = vsel %vm1023_vm15, %v1020_v43, %v1022_v32  ;;  %v1025_v1 = vsel %vm1023_vm15, %v1022_v32, %v1020_v43  ;;  %v1723_v43 = vld [vmem:[%s3321_s9 + $0x78] sm:$0xff]  ;;  %v1738_v32 = vld [vmem:[%s3321_s9 + $0xf0] sm:$0xff] }
 0x1ee   : > { %v1008_v36 = vadd.f32 %v1006_v44, %v999_v35  ;;  %v1009_v62 = vadd.f32 %v1007_v0, %v1000_v61  ;;  %v1739_v35 = vld [vmem:[%s3321_s9 + $0xf8] sm:$0xff]  ;;  %v1722_v61 = vld [vmem:[%s3321_s9 + $0x70] sm:$0xff]  ;;  %v1721_v44 = vld [vmem:[%s3321_s9 + $0x68] sm:$0xff] }
 0x1ef   : > { %v1737_v0 = vld [vmem:[%s3321_s9 + $0xe8] sm:$0xff] }
 0x1f2   : > { %v1013_v46 = vpop.permute.xlu0 %1012 }
 0x1f3   : > { %v1015_v48 = vsel %vm1014_vm14, %v1011_v26, %v1013_v46  ;;  %v1016_v34 = vsel %vm1014_vm14, %v1013_v46, %v1011_v26  ;;  %v1031_v58 = vpop.permute.xlu1 %1030 }
 0x1f4   : > { %v1017_v60 = vadd.f32 %v1015_v48, %v1008_v36  ;;  %v1018_v56 = vadd.f32 %v1016_v34, %v1009_v62  ;;  %v1720_v48 = vld [vmem:[%s3321_s9 + $0x60] sm:$0xff]  ;;  %v1719_v36 = vld [vmem:[%s3321_s9 + $0x58] sm:$0xff] }
 0x1f5   : > { %v1736_v34 = vld [vmem:[%s3321_s9 + $0xe0] sm:$0xff]  ;;  %v1735_v62 = vld [vmem:[%s3321_s9 + $0xd8] sm:$0xff] }
 0x1f6   : > { %v1026_v6 = vadd.f32 %v1024_v63, %v1017_v60  ;;  %v1027_v7 = vadd.f32 %v1025_v1, %v1018_v56  ;;  %v1734_v60 = vld [vmem:[%s3321_s9 + $0xd0] sm:$0xff]  ;;  %v1717_v56 = vld [vmem:[%s3321_s9 + $0x48] sm:$0xff]  ;;  %v1716_v63 = vld [vmem:[%s3321_s9 + $0x40] sm:$0xff] }
 0x1f7   : > { %v1732_v1 = vld [vmem:[%s3321_s9 + $0xc0] sm:$0xff] }
 0x1fa   : > { %v1029_v53 = vpop.permute.xlu0 %1028 }
 0x1fb   : > { %v1033_v3 = vsel %vm1032_vm8, %v1029_v53, %v1031_v58  ;;  %v1034_v4 = vsel %vm1032_vm8, %v1031_v58, %v1029_v53  ;;  %v1718_v53 = vld [vmem:[%s3321_s9 + $0x50] sm:$0xff]  ;;  %v1733_v58 = vld [vmem:[%s3321_s9 + $0xc8] sm:$0xff] }
 0x1fc   : > { %v1035_v9 = vadd.f32 %v1033_v3, %v1026_v6  ;;  %v1036_v37 = vadd.f32 %v1034_v4, %v1027_v7  ;;  %v1715_v3 = vld [vmem:[%s3321_s9 + $0x38] sm:$0xff]  ;;  %v1714_v6 = vld [vmem:[%s3321_s9 + $0x30] sm:$0xff] }
 0x1fd   : > { %v1731_v4 = vld [vmem:[%s3321_s9 + $0xb8] sm:$0xff]  ;;  %v1730_v7 = vld [vmem:[%s3321_s9 + $0xb0] sm:$0xff] }
 0x202   : > { %v1040_v10 = vpop.permute.xlu0 %1039 }
 0x203   : > { %v1042_v59 = vsel %vm1041_vm9, %v1038_v57, %v1040_v10  ;;  %v1043_v54 = vsel %vm1041_vm9, %v1040_v10, %v1038_v57  ;;  %v1713_v57 = vld [vmem:[%s3321_s9 + $0x28] sm:$0xff]  ;;  %v1728_v10 = vld [vmem:[%s3321_s9 + $0xa0] sm:$0xff] }
 0x204   : > { %v1044_v2 = vadd.f32 %v1042_v59, %v1035_v9  ;;  %v1045_v5 = vadd.f32 %v1043_v54, %v1036_v37  ;;  %v1729_v9 = vld [vmem:[%s3321_s9 + $0xa8] sm:$0xff]  ;;  %v1712_v37 = vld [vmem:[%s3321_s9 + $0x20] sm:$0xff]  ;;  %v1711_v59 = vld [vmem:[%s3321_s9 + $0x18] sm:$0xff] }
 0x205   : > { %v1727_v54 = vld [vmem:[%s3321_s9 + $0x98] sm:$0xff] }
 0x206   : > { %v1048_v14 = vmul.f32 0.01, %v1044_v2  ;;  %v1049_v15 = vmul.f32 0.01, %v1045_v5  ;;  %vm1046_vm10 = vcmp.gt.f32.partialorder %v1044_v2, 0.0  ;;  %vm1047_vm11 = vcmp.gt.f32.partialorder %v1045_v5, 0.0 }
 0x208   : > { %v1050_v16 = vsel %vm1046_vm10, %v1044_v2, %v1048_v14  ;;  %v1051_v17 = vsel %vm1047_vm11, %v1045_v5, %v1049_v15  ;;  %v1642_v2 = vpop.permute.xlu1 %1641  ;;  %v1710_v14 = vld [vmem:[%s3321_s9 + $0x10] sm:$0xff] }
 0x209   : > { %1500 = vmatmul.f32.vlgmr.msrb.gmra.mxu2 %v1050_v16  ;;  %1520 = vmatmul.f32.vlgmr.msrb.gmra.mxu3 %v1051_v17  ;;  %v1726_v15 = vld [vmem:[%s3321_s9 + $0x90] sm:$0xff]  ;;  %v1709_v16 = vld [vmem:[%s3321_s9 + $0x8] sm:$0xff] }
 0x20a   : > { %1740 = vmatpush.msrb.mxu2 %v1723_v43  ;;  %1760 = vmatpush.msrb.mxu3 %v1739_v35  ;;  %v1725_v17 = vld [vmem:[%s3321_s9 + $0x88] sm:$0xff] }
 0x20c   : > { %1741 = vmatpush.msrb.mxu2 %v1722_v61  ;;  %1761 = vmatpush.msrb.mxu3 %v1738_v32 }
 0x20e   : > { %1742 = vmatpush.msrb.mxu2 %v1721_v44  ;;  %1762 = vmatpush.msrb.mxu3 %v1737_v0 }
 0x210   : > { %1743 = vmatpush.msrb.mxu2 %v1720_v48  ;;  %1763 = vmatpush.msrb.mxu3 %v1736_v34 }
 0x211   : > { %2001 = vmatmul.msk.f32.vlgmr.msra.gmra.mxu2 %vm434_vm0, %v1524_v18  ;;  %2009 = vmatmul.msk.f32.vlgmr.msra.gmra.mxu3 %vm434_vm0, %v1524_v18 }
 0x212   : > { %1744 = vmatpush.msrb.mxu2 %v1719_v36  ;;  %1764 = vmatpush.msrb.mxu3 %v1735_v62 }
 0x214   : > { %1745 = vmatpush.msrb.mxu2 %v1718_v53  ;;  %1765 = vmatpush.msrb.mxu3 %v1734_v60 }
 0x216   : > { %1746 = vmatpush.msrb.mxu2 %v1717_v56  ;;  %1766 = vmatpush.msrb.mxu3 %v1733_v58 }
 0x218   : > { %1747 = vmatpush.msrb.mxu2 %v1716_v63  ;;  %1767 = vmatpush.msrb.mxu3 %v1732_v1 }
 0x219   : > { %2002 = vmatmul.msk.f32.gmra.mxu2 %vm434_vm0, %v1525_v42  ;;  %2010 = vmatmul.msk.f32.gmra.mxu3 %vm434_vm0, %v1525_v42 }
 0x21a   : > { %1748 = vmatpush.msrb.mxu2 %v1715_v3  ;;  %1768 = vmatpush.msrb.mxu3 %v1731_v4 }
 0x21c   : > { %1749 = vmatpush.msrb.mxu2 %v1714_v6  ;;  %1769 = vmatpush.msrb.mxu3 %v1730_v7 }
 0x21e   : > { %1750 = vmatpush.msrb.mxu2 %v1713_v57  ;;  %1770 = vmatpush.msrb.mxu3 %v1729_v9 }
 0x220   : > { %1751 = vmatpush.msrb.mxu2 %v1712_v37  ;;  %1771 = vmatpush.msrb.mxu3 %v1728_v10 }
 0x221   : > { %2003 = vmatmul.msk.f32.gmra.mxu2 %vm434_vm0, %v1526_v45  ;;  %2011 = vmatmul.msk.f32.gmra.mxu3 %vm434_vm0, %v1526_v45 }
 0x222   : > { %1752 = vmatpush.msrb.mxu2 %v1711_v59  ;;  %1772 = vmatpush.msrb.mxu3 %v1727_v54 }
 0x224   : > { %1753 = vmatpush.msrb.mxu2 %v1710_v14  ;;  %1773 = vmatpush.msrb.mxu3 %v1726_v15 }
 0x226   : > { %1754 = vmatpush.msrb.mxu2 %v1709_v16  ;;  %1774 = vmatpush.msrb.mxu3 %v1725_v17 }
 0x229   : > { %2004 = vmatmul.msk.f32.gmra.mxu2 %vm434_vm0, %v1527_v23  ;;  %2012 = vmatmul.msk.f32.gmra.mxu3 %vm434_vm0, %v1527_v23  ;;  %v1708_v23 = vld [vmem:[%s3321_s9] sm:$0xff] }
 0x22a   : > { %1755 = vmatpush.msrb.mxu2 %v1708_v23 }
 0x231   : > { %2005 = vmatmul.msk.f32.gmra.mxu2 %vm434_vm0, %v1528_v27  ;;  %2013 = vmatmul.msk.f32.gmra.mxu3 %vm434_vm0, %v1528_v27  ;;  %v1724_v27 = vld [vmem:[%s3321_s9 + $0x80] sm:$0xff] }
 0x232   : > { %1775 = vmatpush.msrb.mxu3 %v1724_v27 }
 0x239   : > { %2006 = vmatmul.msk.f32.gmra.mxu2 %vm434_vm0, %v1529_v28  ;;  %2014 = vmatmul.msk.f32.gmra.mxu3 %vm434_vm0, %v1529_v28 }
 0x23c   : > { %v1461_v30 = vpop.f32.mrf.mxu2  ;;  %v1481_v31 = vpop.f32.mrf.mxu3 }
 0x23d   : > { %v1482_v33 = vadd.f32 %v1481_v31, %v1461_v30 }
 0x241   : > { %2007 = vmatmul.msk.f32.gmra.mxu2 %vm434_vm0, %v1530_v29  ;;  %2015 = vmatmul.msk.f32.gmra.mxu3 %vm434_vm0, %v1530_v29 }
 0x249   : > { %2016 = vmatmul.msk.f32.gmra.mxu3 %vm434_vm0, %v1531_v24  ;;  %2008 = vmatmul.msk.f32.gmra.mxu2 %vm434_vm0, %v1531_v24 }
 0x28c   : > { %v1501_v47 = vpop.f32.mrf.mxu2  ;;  %v1521_v39 = vpop.f32.mrf.mxu3 }
 0x28d   : > { %v1502_v41 = vadd.f32 %v1501_v47, %v1482_v33 }
 0x28f   : > { %v3141_v13 = vadd.f32 %v1521_v39, %v1502_v41 }
 0x294   : > { %v3143_v19 = vpop.f32.mrf.mxu2  ;;  %v3145_v12 = vpop.f32.mrf.mxu3 }
 0x295   : > { %v1644_v39 = vadd.f32 %v1642_v2, %v3143_v19  ;;  %v1645_v41 = vadd.f32 %v1642_v2, %v3145_v12 }
 0x29c   : > { %v1576_v21 = vpop.f32.mrf.mxu2  ;;  %v1617_v50 = vpop.f32.mrf.mxu3 }
 0x29d   : > { %1648 = vrot.lane.b32.xlu0 %v1617_v50, %s2128_s26  ;;  %1646 = vrot.lane.b32.xlu2 %v1576_v21, %s2128_s26  ;;  %s3334_s26 = smov 123  }
 0x2a4   : > { %v1579_v26 = vpop.f32.mrf.mxu2  ;;  %v1620_v49 = vpop.f32.mrf.mxu3 }
 0x2a5   : > { %1656 = vrot.lane.b32.xlu2 %v1620_v49, %s2129_s29  ;;  %1654 = vrot.lane.b32.xlu1 %v1579_v26, %s2129_s29  ;;  %s3335_s29 = smov 122  }
 0x2ac   : > { %v1582_v51 = vpop.f32.mrf.mxu2  ;;  %v1623_v52 = vpop.f32.mrf.mxu3 }
 0x2ad   : > { %1664 = vrot.lane.b32.xlu1 %v1623_v52, %s2130_s15  ;;  %1662 = vrot.lane.b32.xlu0 %v1582_v51, %s2130_s15  ;;  %s3336_s15 = smov 121  }
 0x2b4   : > { %v1585_v25 = vpop.f32.mrf.mxu2  ;;  %v1626_v20 = vpop.f32.mrf.mxu3 }
 0x2b5   : > { %1672 = vrot.lane.b32.xlu0 %v1626_v20, %s3333_s25  ;;  %1670 = vrot.lane.b32.xlu2 %v1585_v25, %s3333_s25 }
 0x2bc   : > { %v1588_v22 = vpop.f32.mrf.mxu2  ;;  %v1629_v46 = vpop.f32.mrf.mxu3 }
 0x2bd   : > { %1680 = vrot.lane.b32.xlu2 %v1629_v46, %s3334_s26  ;;  %1678 = vrot.lane.b32.xlu1 %v1588_v22, %s3334_s26 }
 0x2c4   : > { %v1591_v8 = vpop.f32.mrf.mxu2  ;;  %v1632_v38 = vpop.f32.mrf.mxu3 }
 0x2c5   : > { %1688 = vrot.lane.b32.xlu1 %v1632_v38, %s3335_s29  ;;  %1686 = vrot.lane.b32.xlu0 %v1591_v8, %s3335_s29 }
 0x2cc   : > { %v1635_v11 = vpop.f32.mrf.mxu3  ;;  %v1594_v40 = vpop.f32.mrf.mxu2 }
 0x2cd   : > { %1696 = vrot.lane.b32.xlu0 %v1635_v11, %s3336_s15  ;;  %1694 = vrot.lane.b32.xlu2 %v1594_v40, %s3336_s15 }
 0x2f7   : > { %v1647_v5 = vpop.permute.xlu2 %1646 }
 0x2ff   : > { %v1657_v45 = vpop.permute.xlu2 %1656 }
 0x30f   : > { %v1649_v18 = vpop.permute.xlu0 %1648  ;;  %v1671_v24 = vpop.permute.xlu2 %1670 }
 0x310   : > { %v1650_v33 = vsel %vm771_vm1, %v1647_v5, %v1649_v18  ;;  %v1651_v47 = vsel %vm771_vm1, %v1649_v18, %v1647_v5 }
 0x311   : > { %v1652_v26 = vadd.f32 %v1650_v33, %v1644_v39  ;;  %v1653_v49 = vadd.f32 %v1651_v47, %v1645_v41 }
 0x317   : > { %v1655_v42 = vpop.permute.xlu1 %1654  ;;  %v1681_v51 = vpop.permute.xlu2 %1680 }
 0x318   : > { %v1658_v21 = vsel %vm780_vm2, %v1655_v42, %v1657_v45  ;;  %v1659_v50 = vsel %vm780_vm2, %v1657_v45, %v1655_v42  ;;  %vm1783_vm2 = vcmask 556032  }
 0x319   : > { %v1660_v20 = vadd.f32 %v1658_v21, %v1652_v26  ;;  %v1661_v22 = vadd.f32 %v1659_v50, %v1653_v49 }
 0x31f   : > { %v1663_v28 = vpop.permute.xlu0 %1662  ;;  %v1665_v29 = vpop.permute.xlu1 %1664 }
 0x320   : > { %v1666_v52 = vsel %vm789_vm3, %v1663_v28, %v1665_v29  ;;  %v1667_v25 = vsel %vm789_vm3, %v1665_v29, %v1663_v28 }
 0x321   : > { %v1668_v8 = vadd.f32 %v1666_v52, %v1660_v20  ;;  %v1669_v38 = vadd.f32 %v1667_v25, %v1661_v22 }
 0x327   : > { %v1673_v30 = vpop.permute.xlu0 %1672  ;;  %v1695_v34 = vpop.permute.xlu2 %1694 }
 0x328   : > { %v1674_v12 = vsel %vm798_vm4, %v1671_v24, %v1673_v30  ;;  %v1675_v46 = vsel %vm798_vm4, %v1673_v30, %v1671_v24 }
 0x329   : > { %v1676_v35 = vadd.f32 %v1674_v12, %v1668_v8  ;;  %v1677_v61 = vadd.f32 %v1675_v46, %v1669_v38 }
 0x32f   : > { %v1679_v31 = vpop.permute.xlu1 %1678 }
 0x330   : > { %v1682_v40 = vsel %vm807_vm5, %v1679_v31, %v1681_v51  ;;  %v1683_v43 = vsel %vm807_vm5, %v1681_v51, %v1679_v31 }
 0x331   : > { %v1684_v0 = vadd.f32 %v1682_v40, %v1676_v35  ;;  %v1685_v48 = vadd.f32 %v1683_v43, %v1677_v61 }
 0x337   : > { %v1687_v19 = vpop.permute.xlu0 %1686  ;;  %v1689_v11 = vpop.permute.xlu1 %1688 }
 0x338   : > { %v1690_v32 = vsel %vm816_vm6, %v1687_v19, %v1689_v11  ;;  %v1691_v44 = vsel %vm816_vm6, %v1689_v11, %v1687_v19 }
 0x339   : > { %v1692_v36 = vadd.f32 %v1690_v32, %v1684_v0  ;;  %v1693_v62 = vadd.f32 %v1691_v44, %v1685_v48 }
 0x33f   : > { %v1697_v53 = vpop.permute.xlu0 %1696 }
 0x340   : > { %v1698_v60 = vsel %vm825_vm7, %v1695_v34, %v1697_v53  ;;  %v1699_v56 = vsel %vm825_vm7, %v1697_v53, %v1695_v34 }
 0x341   : > { %v1700_v58 = vadd.f32 %v1698_v60, %v1692_v36  ;;  %v1701_v63 = vadd.f32 %v1699_v56, %v1693_v62 }
 0x343   : > { %vm1702_vm0 = vcmp.gt.f32.partialorder %v1700_v58, 0.0  ;;  %vm1703_vm1 = vcmp.gt.f32.partialorder %v1701_v63, 0.0  ;;  %v1704_v1 = vmul.f32 0.01, %v1700_v58  ;;  %v1705_v3 = vmul.f32 0.01, %v1701_v63 }
 0x345   : > { %v1706_v4 = vsel %vm1702_vm0, %v1700_v58, %v1704_v1  ;;  %v1707_v6 = vsel %vm1703_vm1, %v1701_v63, %v1705_v3 }
 0x346   : > { %1756 = vmatmul.f32.vlgmr.msrb.gmra.mxu2 %v1706_v4  ;;  %1776 = vmatmul.f32.vlgmr.msrb.gmra.mxu3 %v1707_v6 }
 0x3c9   : > { %v1757_v7 = vpop.f32.mrf.mxu2  ;;  %v1777_v57 = vpop.f32.mrf.mxu3 }
 0x3ca   : > { %v1778_v9 = vadd.f32 %v1777_v57, %v1757_v7  ;;  %1788 = sbr.rel (%p2018_p4) target bundleno = 1258 (0x4ea), region = 72 }
 0x3cc   : > { %v1780_v37 = vadd.f32 %v1778_v9, %v3141_v13 }
 0x3ce   : > { %1784 = vst.msk [vmem:[%s1782_s28] sm:$0xff] %vm1783_vm2, %v1780_v37 }
 0x3cf   : > { %v2159_v14 = vmov 136.0   ;;  %v1829_v13 = vld [vmem:[%s3322_s10] sm:$0xff]  ;;  %v2160_v16 = vmov 0  }
 0x3d0   : > { %2083 = vrcp.f32 %v2159_v14  ;;  %2081 = vset.pattern.permute.xlu1 %v2160_v16  ;;  %2082 = vset.pattern.permute.xlu0 %v2160_v16  ;;  %v1837_v42 = vld [vmem:[%s3323_s11] sm:$0xff] }
 0x3d1   : > { %1832 = vperm.xlu1 %2081, %v1829_v13  }
 0x3d5   : > { %v1789_v55 = vld [vmem:[#allocation2] sm:$0xff]  ;;  %v1790_v10 = vld [vmem:[#allocation2 + $0x8] sm:$0xff] }
 0x3d6   : > { %v1791_v59 = vsel %vm1783_vm2, %v1789_v55, 0.0  ;;  %v1792_v54 = vsel %vm1783_vm2, %v1790_v10, 0.0  ;;  %v2084_v15 = vpop.eup %2083 }
 0x3d7   : > { %v1793_v2 = vadd.f32 %v1792_v54, %v1791_v59  ;;  %v1798_v17 = vmul.f32 136.0, %v2084_v15  ;;  %vm1802_vm3 = vweird.f32 %v2084_v15 }
 0x3d9   : > { %v1794_v5 = vsel %vm1783_vm2, %v1793_v2, 0.0  ;;  %v1799_v18 = vsub.f32 1.0, %v1798_v17  ;;  %1840 = vperm.xlu1 %2081, %v1837_v42  }
 0x3da   : > { %1795 = vadd.xlane.f32.xlu0 %v1794_v5 }
 0x3db   : > { %v1800_v45 = vmul.f32 %v2084_v15, %v1799_v18 }
 0x3dd   : > { %v1801_v23 = vadd.f32 %v2084_v15, %v1800_v45 }
 0x3df   : > { %v1803_v27 = vsel %vm1802_vm3, %v2084_v15, %v1801_v23 }
 0x443   : > { %v1833_v22 = vpop.permute.xlu1 %1832 }
 0x44b   : > { %v1841_v43 = vpop.permute.xlu1 %1840 }
 0x44d   : > { %v1796_v28 = vpop.xlane.xlu0 %1795 }
 0x44e   : > { %v1804_v29 = vmul.f32 %v1803_v27, %v1796_v28 }
 0x450   : > { %v1805_v24 = vsub.f32 %v1789_v55, %v1804_v29  ;;  %v1806_v30 = vsub.f32 %v1790_v10, %v1804_v29 }
 0x452   : > { %v1807_v31 = vmul.f32 %v1805_v24, %v1805_v24  ;;  %v1808_v33 = vmul.f32 %v1806_v30, %v1806_v30 }
 0x454   : > { %v1809_v47 = vsel %vm1783_vm2, %v1807_v31, 0.0  ;;  %v1810_v39 = vsel %vm1783_vm2, %v1808_v33, 0.0 }
 0x455   : > { %v1811_v41 = vadd.f32 %v1810_v39, %v1809_v47 }
 0x457   : > { %v1812_v21 = vsel %vm1783_vm2, %v1811_v41, 0.0 }
 0x458   : > { %1813 = vadd.xlane.f32.xlu0 %v1812_v21 }
 0x4cb   : > { %v1814_v50 = vpop.xlane.xlu0 %1813 }
 0x4cc   : > { %v1815_v26 = vmul.f32 %v1814_v50, %v1803_v27 }
 0x4ce   : > { %v1816_v49 = vadd.f32 1e-05, %v1815_v26 }
 0x4d0   : > { %2085 = vrsqrt.f32 %v1816_v49  ;;  %vm1823_vm5 = vweird.f32 %v1816_v49 }
 0x4d6   : > { %v2086_v51 = vpop.eup %2085 }
 0x4d7   : > { %v1818_v52 = vmul.f32 %v2086_v51, %v1816_v49  ;;  %vm1824_vm4 = vweird.f32 %v2086_v51 }
 0x4d8   : > { %vm1825_vm6 = vmor %vm1823_vm5, %vm1824_vm4 }
 0x4d9   : > { %v1819_v25 = vmul.f32 %v2086_v51, %v1818_v52 }
 0x4db   : > { %v1820_v20 = vmul.f32 0.5, %v1819_v25 }
 0x4dd   : > { %v1821_v19 = vsub.f32 1.5, %v1820_v20 }
 0x4df   : > { %v1822_v12 = vmul.f32 %v2086_v51, %v1821_v19 }
 0x4e1   : > { %v1826_v46 = vsel %vm1825_vm6, %v2086_v51, %v1822_v12 }
 0x4e2   : > { %v1827_v8 = vmul.f32 %v1826_v46, %v1805_v24  ;;  %v1828_v38 = vmul.f32 %v1826_v46, %v1806_v30 }
 0x4e4   : > { %v1835_v11 = vmul.f32 %v1833_v22, %v1827_v8  ;;  %v1836_v40 = vmul.f32 %v1833_v22, %v1828_v38 }
 0x4e6   : > { %v1843_v35 = vadd.f32 %v1841_v43, %v1835_v11  ;;  %v1844_v61 = vadd.f32 %v1841_v43, %v1836_v40 }
 0x4e8   : > { %1845 = vst.msk [vmem:[#allocation2] sm:$0xff] %vm1783_vm2, %v1843_v35 }
 0x4e9   : > { %1846 = vst.msk [vmem:[#allocation2 + $0x8] sm:$0xff] %vm1783_vm2, %v1844_v61 }
 0x4ea PF: > { %p2030_p5 = scmp.eq.s32.totalorder %s2235_s22, 1  ;;  %s2161_s19 = smov [#allocation2]  }
 0x4eb   : > { %s1852_s17 = sshll.u32 %s2161_s19, 4  ;;  %s1854_s16 = sshll.u32 %s3324_s12, 4  ;;  %s1853_s17 = int_to_ptr.vmem [resolvable:$true] %s1852_s17  ;;  %s1855_s16 = int_to_ptr.hbm [resolvable:$true] %s1854_s16 }
 0x4ec   : > { %s2162_s18 = smov 128   ;;  %s2163_s25 = smov 8  }
 0x4ed   : > { %2027 = dma.vmem_to_hbm [thread:$0]  (%p2030_p5), %s1853_s17, 256, %s1855_s16, [#allocation3], %s2162_s18, %s2162_s18, %s2163_s25  }
 0x4ee   : > { %2120 = dma.done.wait (%p2030_p5), [#allocation3], 256  }
 0x4ef   : > { %2122 = vsyncadd (%p2030_p5), [#allocation3], 4294967040 }
 0x4f0 PF: > { %s23_s21 = sadd.s32 1, %s2125_s21  }
 0x4f1   : > { %p20_p6 = scmp.ge.s32.totalorder %s23_s21, 4  }
 0x4f3   :  { %22 = sbr.rel (!%p20_p6) target bundleno = 1 (0x1), region = 100 }
 0x4f8   :  { %1871 = vsyncpa [#allocation3], 1 }
 0x4f9   :  { %1873 = vsyncpa [#allocation3 + $0x1], 1 }

</bundles_post_ra>
